<compile_context>
chip_gen: v7x
topology: tpu7x:2x2x1
jax: 0.10.0
libtpu: 0.0.40
codegen_flags: <defaults>
</compile_context>

<pallas_src>
import jax
import jax.numpy as jnp
from jax.experimental import pallas as pl
from jax.experimental.pallas import tpu as pltpu


def _round_up(x, m):
    return ((x + m - 1) // m) * m


def _pad2d(x, rows, cols):
    if x.shape == (rows, cols):
        return x
    return jnp.pad(x, ((0, rows - x.shape[0]), (0, cols - x.shape[1])))


def fused_gcn_kernel(a_ref, x_ref, w1t_ref, b1_ref, w2t_ref, b2_ref,
                     o_ref, xw1_ref, h1_ref, h1w2_ref, acc_ref):
    """Fused 2-layer GCN.

    Grid = (phase, i, k); phase is the slowest axis:
      phase 0:  H1[i*TM:(i+1)*TM] = relu( sum_k A[i,k] @ (X @ W1^T + b1)[k] )
      phase 1:  OUT[i*TM:(i+1)*TM] = relu( sum_k A[i,k] @ (H1 @ W2^T + b2)[k] )

    a_ref   : (TM, TK) bf16   streamed adjacency tile
    x_ref   : (Np, Fi)        VMEM-resident node features
    w1t_ref : (Fi, H)         VMEM-resident, pre-transposed layer-1 weight
    b1_ref  : (1, H)
    w2t_ref : (H, C)          VMEM-resident, pre-transposed layer-2 weight
    b2_ref  : (1, C)
    o_ref   : (TM, C)         output tile (lane-dense, C a 128 multiple)
    scratch : xw1 (Np, H), h1 (Np, H), h1w2 (Np, C), acc (TM, max(H,C)) f32
    """
    phase = pl.program_id(0)
    i = pl.program_id(1)
    k = pl.program_id(2)
    nk = pl.num_programs(2)
    tm, tk = a_ref.shape
    h_pad = xw1_ref.shape[1]
    c_pad = h1w2_ref.shape[1]

    ks = pl.multiple_of(k * tk, tk)
    row = pl.multiple_of(i * tm, tm)

    # ---- per-phase dense node-wise linear, spread across the k loop ----
    # Each (tk, .) slice is produced right before the first A tile that
    # consumes it, so this MXU work hides under the A-tile DMA pipeline.
    @pl.when((phase == 0) & (i == 0))
    def _():
        xw1_ref[pl.ds(ks, tk), :] = (
            jnp.dot(x_ref[pl.ds(ks, tk), :], w1t_ref[...],
                    preferred_element_type=jnp.float32)
            + b1_ref[...]
        ).astype(xw1_ref.dtype)

    @pl.when((phase == 1) & (i == 0))
    def _():
        h1w2_ref[pl.ds(ks, tk), :] = (
            jnp.dot(h1_ref[pl.ds(ks, tk), :], w2t_ref[...],
                    preferred_element_type=jnp.float32)
            + b2_ref[...]
        ).astype(h1w2_ref.dtype)

    # ---- shared accumulator init on the reduction axis ----
    @pl.when(k == 0)
    def _():
        acc_ref[...] = jnp.zeros_like(acc_ref)

    # ---- phase 0: layer-1 aggregation into the resident H1 scratch ----
    @pl.when(phase == 0)
    def _():
        acc_ref[:, :h_pad] += jnp.dot(a_ref[...], xw1_ref[pl.ds(ks, tk), :],
                                      preferred_element_type=jnp.float32)

        @pl.when(k == nk - 1)
        def _():
            h1_ref[pl.ds(row, tm), :] = jnp.maximum(
                acc_ref[:, :h_pad], 0.0).astype(h1_ref.dtype)
            # No o_ref write in phase 0: the output block index is pinned to
            # (0, 0) for the whole phase, so nothing is flushed to HBM.

    # ---- phase 1: layer-2 aggregation straight to the output tile ----
    @pl.when(phase == 1)
    def _():
        acc_ref[:, :c_pad] += jnp.dot(a_ref[...], h1w2_ref[pl.ds(ks, tk), :],
                                      preferred_element_type=jnp.float32)

        @pl.when(k == nk - 1)
        def _():
            o_ref[...] = jnp.maximum(acc_ref[:, :c_pad], 0.0).astype(o_ref.dtype)


def gcn_forward(a, x, params, *, tile=None, compute_dtype=jnp.float32):
    """Full GCN forward: relu(A @ (relu(A @ (X W1^T + b1)) W2^T + b2)).

    compute_dtype may be set to jnp.bfloat16 on v6e/v7x for extra MXU/HBM
    throughput (accumulation stays f32); the default keeps f32 exactness.
    The adjacency is always streamed as bf16 (exact for 0/1 values).
    """
    w1, b1, w2, b2 = params
    n, in_feats = x.shape
    hidden = w1.shape[0]
    num_classes = w2.shape[0]

    lane = 128
    if tile is None:
        tile = 512 if n >= 2048 else (256 if n >= 512 else 128)
    tm = tk = tile

    n_pad = _round_up(n, tile)
    fi_pad = _round_up(in_feats, lane)
    h_pad = _round_up(hidden, lane)
    c_pad = _round_up(num_classes, lane)

    # A values are exactly 0/1 -> bf16 cast is lossless and halves the
    # dominant HBM stream (A is read twice, once per layer).  Avoid the pad
    # copy when shapes already line up.
    a_c = a if a.dtype == jnp.bfloat16 else a.astype(jnp.bfloat16)
    a_p = _pad2d(a_c, n_pad, n_pad)

    # Zero-padding is exact for this computation (padded A rows/cols and
    # padded W/b entries are 0; bias leakage into padded rows is killed by A's
    # zero columns).
    x_p = _pad2d(x.astype(compute_dtype), n_pad, fi_pad)
    w1t_p = _pad2d(w1.T.astype(compute_dtype), fi_pad, h_pad)   # pre-transposed
    w2t_p = _pad2d(w2.T.astype(compute_dtype), h_pad, c_pad)    # pre-transposed
    b1_p = _pad2d(b1.reshape(1, -1).astype(jnp.float32), 1, h_pad)
    b2_p = _pad2d(b2.reshape(1, -1).astype(jnp.float32), 1, c_pad)

    grid = (2, n_pad // tm, n_pad // tk)   # (phase, row tiles, reduction tiles)

    acc_w = max(h_pad, c_pad)
    cbytes = jnp.dtype(compute_dtype).itemsize
    vmem_need = (
        2 * tm * tk * 2                                  # double-buffered bf16 A tiles
        + 2 * tm * c_pad * 4                             # double-buffered f32 out tiles
        + n_pad * fi_pad * cbytes                        # resident X
        + (fi_pad * h_pad + h_pad * c_pad) * cbytes      # resident weights
        + (h_pad + c_pad) * 4                            # biases
        + n_pad * (2 * h_pad + c_pad) * cbytes           # xw1, h1, h1w2 scratch
        + tm * acc_w * 4                                 # shared accumulator
    )
    vmem_limit = max(int(vmem_need * 1.2) + (4 << 20), 32 << 20)

    out = pl.pallas_call(
        fused_gcn_kernel,
        out_shape=jax.ShapeDtypeStruct((n_pad, c_pad), jnp.float32),
        grid_spec=pltpu.PrefetchScalarGridSpec(
            num_scalar_prefetch=0,
            grid=grid,
            in_specs=[
                # A: streamed (TM, TK) bf16 tiles.
                pl.BlockSpec((tm, tk), lambda p, i, k: (i, k)),
                # Everything else: whole-array VMEM residency (no double buffer).
                pl.BlockSpec(memory_space=pltpu.MemorySpace.VMEM),
                pl.BlockSpec(memory_space=pltpu.MemorySpace.VMEM),
                pl.BlockSpec(memory_space=pltpu.MemorySpace.VMEM),
                pl.BlockSpec(memory_space=pltpu.MemorySpace.VMEM),
                pl.BlockSpec(memory_space=pltpu.MemorySpace.VMEM),
            ],
            # Phase-aware map: phase 0 pins the block to (0,0) (never written,
            # never flushed); phase 1 writes the real row tiles.
            out_specs=pl.BlockSpec((tm, c_pad), lambda p, i, k: (i * p, 0)),
            scratch_shapes=[
                pltpu.VMEM((n_pad, h_pad), compute_dtype),   # X W1^T + b1
                pltpu.VMEM((n_pad, h_pad), compute_dtype),   # H1 = relu(A @ .)
                pltpu.VMEM((n_pad, c_pad), compute_dtype),   # H1 W2^T + b2
                pltpu.VMEM((tm, acc_w), jnp.float32),        # shared accumulator
            ],
        ),
        compiler_params=pltpu.CompilerParams(
            dimension_semantics=("arbitrary", "arbitrary", "arbitrary"),
            vmem_limit_bytes=vmem_limit,
        ),
    )(a_p, x_p, w1t_p, b1_p, w2t_p, b2_p)

    return out[:n, :num_classes]


def init_params(key, in_feats, hidden_size, num_classes):
    """Deterministic nn.Linear-style init (uniform(-1/sqrt(fan_in), 1/sqrt(fan_in)))."""
    k1, k2, k3, k4 = jax.random.split(key, 4)
    lim1 = 1.0 / jnp.sqrt(in_feats)
    lim2 = 1.0 / jnp.sqrt(hidden_size)
    w1 = jax.random.uniform(k1, (hidden_size, in_feats), jnp.float32, -lim1, lim1)
    b1 = jax.random.uniform(k2, (hidden_size,), jnp.float32, -lim1, lim1)
    w2 = jax.random.uniform(k3, (num_classes, hidden_size), jnp.float32, -lim2, lim2)
    b2 = jax.random.uniform(k4, (num_classes,), jnp.float32, -lim2, lim2)
    return (w1, b1, w2, b2)


def _reference(a, x, params):
    w1, b1, w2, b2 = params
    af = a.astype(jnp.float32)
    h = jnp.maximum(af @ (x @ w1.T + b1), 0.0)
    return jnp.maximum(af @ (h @ w2.T + b2), 0.0)


def _make_graph(key, n):
    a = (jax.random.uniform(key, (n, n)) < 0.3).astype(jnp.float32)
    a = jnp.maximum(a, jnp.eye(n, dtype=jnp.float32))
    # Adjacency is 0/1 -> bf16 is exact; build it in bf16 so the wrapper does
    # not need an extra HBM cast copy.
    return a.astype(jnp.bfloat16)


if __name__ == "__main__":
    key = jax.random.PRNGKey(0)

    # --- small case, matching the module defaults ---
    N, in_feats, hidden_size, num_classes = 8, 16, 32, 8
    k_x, k_a, k_p, k_x2, k_a2, k_p2 = jax.random.split(key, 6)

    x = jax.random.normal(k_x, (N, in_feats), dtype=jnp.float32)
    a = _make_graph(k_a, N)
    params = init_params(k_p, in_feats, hidden_size, num_classes)

    out = jax.block_until_ready(gcn_forward(a, x, params))
    ref = _reference(a, x, params)
    assert out.shape == (N, num_classes)
    assert jnp.allclose(out, ref, atol=1e-4, rtol=1e-4)

    # --- larger case: exercises padding, multiple row tiles and the
    #     k-reduction accumulator (grid = (2, 2, 2)) ---
    N2, in2, hid2, cls2 = 200, 48, 64, 16
    x2 = jax.random.normal(k_x2, (N2, in2), dtype=jnp.float32)
    a2 = _make_graph(k_a2, N2)
    params2 = init_params(k_p2, in2, hid2, cls2)

    out2 = jax.block_until_ready(gcn_forward(a2, x2, params2))
    ref2 = _reference(a2, x2, params2)
    assert out2.shape == (N2, cls2)
    assert jnp.allclose(out2, ref2, atol=1e-3, rtol=1e-3)

    print("KERNEL_OK")
</pallas_src>

<mosaic_0001>
module attributes {stable_mosaic.version = 11 : i64} {
  func.func @fused_gcn_kernel(%arg0: i32, %arg1: i32, %arg2: i32, %arg3: memref<128x128xbf16, #tpu.memory_space<vmem>>, %arg4: memref<128x128xf32, #tpu.memory_space<vmem>>, %arg5: memref<128x128xf32, #tpu.memory_space<vmem>>, %arg6: memref<1x128xf32, #tpu.memory_space<vmem>>, %arg7: memref<128x128xf32, #tpu.memory_space<vmem>>, %arg8: memref<1x128xf32, #tpu.memory_space<vmem>>, %arg9: memref<128x128xf32, #tpu.memory_space<vmem>>, %arg10: memref<128x128xf32, #tpu.memory_space<vmem>>, %arg11: memref<128x128xf32, #tpu.memory_space<vmem>>, %arg12: memref<128x128xf32, #tpu.memory_space<vmem>>, %arg13: memref<128x128xf32, #tpu.memory_space<vmem>>) attributes {dimension_semantics = [#tpu.dimension_semantics<arbitrary>, #tpu.dimension_semantics<arbitrary>, #tpu.dimension_semantics<arbitrary>], iteration_bounds = array<i64: 2, 1, 1>, scalar_prefetch = 0 : i64, scratch_operands = 4 : i64, tpu.core_type = #tpu.core_type<tc>, window_params = [{transform_indices = @transform_0, window_bounds = array<i64: 128, 128>}, {pipeline_mode = #tpu.pipeline_mode<synchronous>, transform_indices = @transform_1, window_bounds = array<i64: 128, 128>}, {pipeline_mode = #tpu.pipeline_mode<synchronous>, transform_indices = @transform_2, window_bounds = array<i64: 128, 128>}, {pipeline_mode = #tpu.pipeline_mode<synchronous>, transform_indices = @transform_3, window_bounds = array<i64: 1, 128>}, {pipeline_mode = #tpu.pipeline_mode<synchronous>, transform_indices = @transform_4, window_bounds = array<i64: 128, 128>}, {pipeline_mode = #tpu.pipeline_mode<synchronous>, transform_indices = @transform_5, window_bounds = array<i64: 1, 128>}, {transform_indices = @transform_6, window_bounds = array<i64: 128, 128>}]} {
    %c128_i32 = arith.constant 128 : i32
    %0 = arith.muli %arg2, %c128_i32 : i32
    %1 = tpu.assume_multiple %0, 128 : i32
    %c128_i32_0 = arith.constant 128 : i32
    %2 = arith.muli %arg1, %c128_i32_0 : i32
    %3 = tpu.assume_multiple %2, 128 : i32
    %c0_i32 = arith.constant 0 : i32
    %4 = arith.cmpi eq, %arg0, %c0_i32 : i32
    %c0_i32_1 = arith.constant 0 : i32
    %5 = arith.cmpi eq, %arg1, %c0_i32_1 : i32
    %6 = arith.andi %4, %5 : i1
    %7 = arith.extui %6 : i1 to i32
    %c0_i32_2 = arith.constant 0 : i32
    %8 = arith.cmpi ne, %7, %c0_i32_2 : i32
    scf.if %8 {
      %23 = arith.index_cast %1 : i32 to index
      %c0 = arith.constant 0 : index
      %24 = vector.load %arg4[%23, %c0] : memref<128x128xf32, #tpu.memory_space<vmem>>, vector<128x128xf32>
      %c0_11 = arith.constant 0 : index
      %c0_12 = arith.constant 0 : index
      %25 = vector.load %arg5[%c0_11, %c0_12] : memref<128x128xf32, #tpu.memory_space<vmem>>, vector<128x128xf32>
      %cst = arith.constant dense<0.000000e+00> : vector<128x128xf32>
      %26 = tpu.matmul %24, %25, %cst {dimension_numbers = #tpu.dot_dimension_numbers<[1], [0], [0], [1], [0, 0, 1, 1], [], []>} : vector<128x128xf32>, vector<128x128xf32>, vector<128x128xf32> -> vector<128x128xf32>
      %c0_13 = arith.constant 0 : index
      %c0_14 = arith.constant 0 : index
      %27 = vector.load %arg6[%c0_13, %c0_14] : memref<1x128xf32, #tpu.memory_space<vmem>>, vector<1x128xf32>
      %28 = vector.broadcast %27 : vector<1x128xf32> to vector<128x128xf32>
      %29 = arith.addf %26, %28 : vector<128x128xf32>
      %30 = arith.index_cast %1 : i32 to index
      %c0_15 = arith.constant 0 : index
      %31 = vector.load %arg10[%30, %c0_15] : memref<128x128xf32, #tpu.memory_space<vmem>>, vector<128x128xf32>
      tpu.vector_store %arg10[%30, %c0_15], %29 {strides = array<i32>} : memref<128x128xf32, #tpu.memory_space<vmem>>, vector<128x128xf32>,
    } else {
    }
    %c1_i32 = arith.constant 1 : i32
    %9 = arith.cmpi eq, %arg0, %c1_i32 : i32
    %c0_i32_3 = arith.constant 0 : i32
    %10 = arith.cmpi eq, %arg1, %c0_i32_3 : i32
    %11 = arith.andi %9, %10 : i1
    %12 = arith.extui %11 : i1 to i32
    %c0_i32_4 = arith.constant 0 : i32
    %13 = arith.cmpi ne, %12, %c0_i32_4 : i32
    scf.if %13 {
      %23 = arith.index_cast %1 : i32 to index
      %c0 = arith.constant 0 : index
      %24 = vector.load %arg11[%23, %c0] : memref<128x128xf32, #tpu.memory_space<vmem>>, vector<128x128xf32>
      %c0_11 = arith.constant 0 : index
      %c0_12 = arith.constant 0 : index
      %25 = vector.load %arg7[%c0_11, %c0_12] : memref<128x128xf32, #tpu.memory_space<vmem>>, vector<128x128xf32>
      %cst = arith.constant dense<0.000000e+00> : vector<128x128xf32>
      %26 = tpu.matmul %24, %25, %cst {dimension_numbers = #tpu.dot_dimension_numbers<[1], [0], [0], [1], [0, 0, 1, 1], [], []>} : vector<128x128xf32>, vector<128x128xf32>, vector<128x128xf32> -> vector<128x128xf32>
      %c0_13 = arith.constant 0 : index
      %c0_14 = arith.constant 0 : index
      %27 = vector.load %arg8[%c0_13, %c0_14] : memref<1x128xf32, #tpu.memory_space<vmem>>, vector<1x128xf32>
      %28 = vector.broadcast %27 : vector<1x128xf32> to vector<128x128xf32>
      %29 = arith.addf %26, %28 : vector<128x128xf32>
      %30 = arith.index_cast %1 : i32 to index
      %c0_15 = arith.constant 0 : index
      %31 = vector.load %arg12[%30, %c0_15] : memref<128x128xf32, #tpu.memory_space<vmem>>, vector<128x128xf32>
      tpu.vector_store %arg12[%30, %c0_15], %29 {strides = array<i32>} : memref<128x128xf32, #tpu.memory_space<vmem>>, vector<128x128xf32>,
    } else {
    }
    %c0_i32_5 = arith.constant 0 : i32
    %14 = arith.cmpi eq, %arg2, %c0_i32_5 : i32
    %15 = arith.extui %14 : i1 to i32
    %c0_i32_6 = arith.constant 0 : i32
    %16 = arith.cmpi ne, %15, %c0_i32_6 : i32
    scf.if %16 {
      %cst = arith.constant 0.000000e+00 : f32
      %23 = vector.broadcast %cst : f32 to vector<128x128xf32>
      %c0 = arith.constant 0 : index
      %c0_11 = arith.constant 0 : index
      %24 = vector.load %arg13[%c0, %c0_11] : memref<128x128xf32, #tpu.memory_space<vmem>>, vector<128x128xf32>
      tpu.vector_store %arg13[%c0, %c0_11], %23 {strides = array<i32>} : memref<128x128xf32, #tpu.memory_space<vmem>>, vector<128x128xf32>,
    } else {
    }
    %c0_i32_7 = arith.constant 0 : i32
    %17 = arith.cmpi eq, %arg0, %c0_i32_7 : i32
    %18 = arith.extui %17 : i1 to i32
    %c0_i32_8 = arith.constant 0 : i32
    %19 = arith.cmpi ne, %18, %c0_i32_8 : i32
    scf.if %19 {
      %c0 = arith.constant 0 : index
      %c0_11 = arith.constant 0 : index
      %23 = vector.load %arg13[%c0, %c0_11] : memref<128x128xf32, #tpu.memory_space<vmem>>, vector<128x128xf32>
      %c0_12 = arith.constant 0 : index
      %c0_13 = arith.constant 0 : index
      %24 = vector.load %arg3[%c0_12, %c0_13] : memref<128x128xbf16, #tpu.memory_space<vmem>>, vector<128x128xbf16>
      %25 = arith.index_cast %1 : i32 to index
      %c0_14 = arith.constant 0 : index
      %26 = vector.load %arg10[%25, %c0_14] : memref<128x128xf32, #tpu.memory_space<vmem>>, vector<128x128xf32>
      %cst = arith.constant dense<0.000000e+00> : vector<128x128xf32>
      %27 = tpu.matmul %24, %26, %cst {dimension_numbers = #tpu.dot_dimension_numbers<[1], [0], [0], [1], [0, 0, 1, 1], [], []>} : vector<128x128xbf16>, vector<128x128xf32>, vector<128x128xf32> -> vector<128x128xf32>
      %28 = arith.addf %23, %27 : vector<128x128xf32>
      %c0_15 = arith.constant 0 : index
      %c0_16 = arith.constant 0 : index
      %29 = vector.load %arg13[%c0_15, %c0_16] : memref<128x128xf32, #tpu.memory_space<vmem>>, vector<128x128xf32>
      tpu.vector_store %arg13[%c0_15, %c0_16], %28 {strides = array<i32>} : memref<128x128xf32, #tpu.memory_space<vmem>>, vector<128x128xf32>,
      %c0_i32_17 = arith.constant 0 : i32
      %30 = arith.cmpi eq, %arg2, %c0_i32_17 : i32
      %31 = arith.extui %30 : i1 to i32
      %c0_i32_18 = arith.constant 0 : i32
      %32 = arith.cmpi ne, %31, %c0_i32_18 : i32
      scf.if %32 {
        %c0_19 = arith.constant 0 : index
        %c0_20 = arith.constant 0 : index
        %33 = vector.load %arg13[%c0_19, %c0_20] : memref<128x128xf32, #tpu.memory_space<vmem>>, vector<128x128xf32>
        %cst_21 = arith.constant 0.000000e+00 : f32
        %34 = vector.broadcast %cst_21 : f32 to vector<128x128xf32>
        %35 = arith.maximumf %33, %34 : vector<128x128xf32>
        %36 = arith.index_cast %3 : i32 to index
        %c0_22 = arith.constant 0 : index
        %37 = vector.load %arg11[%36, %c0_22] : memref<128x128xf32, #tpu.memory_space<vmem>>, vector<128x128xf32>
        tpu.vector_store %arg11[%36, %c0_22], %35 {strides = array<i32>} : memref<128x128xf32, #tpu.memory_space<vmem>>, vector<128x128xf32>,
      } else {
      }
    } else {
    }
    %c1_i32_9 = arith.constant 1 : i32
    %20 = arith.cmpi eq, %arg0, %c1_i32_9 : i32
    %21 = arith.extui %20 : i1 to i32
    %c0_i32_10 = arith.constant 0 : i32
    %22 = arith.cmpi ne, %21, %c0_i32_10 : i32
    scf.if %22 {
      %c0 = arith.constant 0 : index
      %c0_11 = arith.constant 0 : index
      %23 = vector.load %arg13[%c0, %c0_11] : memref<128x128xf32, #tpu.memory_space<vmem>>, vector<128x128xf32>
      %c0_12 = arith.constant 0 : index
      %c0_13 = arith.constant 0 : index
      %24 = vector.load %arg3[%c0_12, %c0_13] : memref<128x128xbf16, #tpu.memory_space<vmem>>, vector<128x128xbf16>
      %25 = arith.index_cast %1 : i32 to index
      %c0_14 = arith.constant 0 : index
      %26 = vector.load %arg12[%25, %c0_14] : memref<128x128xf32, #tpu.memory_space<vmem>>, vector<128x128xf32>
      %cst = arith.constant dense<0.000000e+00> : vector<128x128xf32>
      %27 = tpu.matmul %24, %26, %cst {dimension_numbers = #tpu.dot_dimension_numbers<[1], [0], [0], [1], [0, 0, 1, 1], [], []>} : vector<128x128xbf16>, vector<128x128xf32>, vector<128x128xf32> -> vector<128x128xf32>
      %28 = arith.addf %23, %27 : vector<128x128xf32>
      %c0_15 = arith.constant 0 : index
      %c0_16 = arith.constant 0 : index
      %29 = vector.load %arg13[%c0_15, %c0_16] : memref<128x128xf32, #tpu.memory_space<vmem>>, vector<128x128xf32>
      tpu.vector_store %arg13[%c0_15, %c0_16], %28 {strides = array<i32>} : memref<128x128xf32, #tpu.memory_space<vmem>>, vector<128x128xf32>,
      %c0_i32_17 = arith.constant 0 : i32
      %30 = arith.cmpi eq, %arg2, %c0_i32_17 : i32
      %31 = arith.extui %30 : i1 to i32
      %c0_i32_18 = arith.constant 0 : i32
      %32 = arith.cmpi ne, %31, %c0_i32_18 : i32
      scf.if %32 {
        %c0_19 = arith.constant 0 : index
        %c0_20 = arith.constant 0 : index
        %33 = vector.load %arg13[%c0_19, %c0_20] : memref<128x128xf32, #tpu.memory_space<vmem>>, vector<128x128xf32>
        %cst_21 = arith.constant 0.000000e+00 : f32
        %34 = vector.broadcast %cst_21 : f32 to vector<128x128xf32>
        %35 = arith.maximumf %33, %34 : vector<128x128xf32>
        %c0_22 = arith.constant 0 : index
        %c0_23 = arith.constant 0 : index
        %36 = vector.load %arg9[%c0_22, %c0_23] : memref<128x128xf32, #tpu.memory_space<vmem>>, vector<128x128xf32>
        tpu.vector_store %arg9[%c0_22, %c0_23], %35 {strides = array<i32>} : memref<128x128xf32, #tpu.memory_space<vmem>>, vector<128x128xf32>,
      } else {
      }
    } else {
    }
    return
  }
  func.func @transform_0(%arg0: i32, %arg1: i32, %arg2: i32) -> (i32, i32) {
    %c0_i32 = arith.constant 0 : i32
    return %arg1, %arg2 : i32, i32
  }
  func.func @transform_1(%arg0: i32, %arg1: i32, %arg2: i32) -> (i32, i32) {
    %c0_i32 = arith.constant 0 : i32
    %c0_i32_0 = arith.constant 0 : i32
    %c0_i32_1 = arith.constant 0 : i32
    return %c0_i32, %c0_i32_0 : i32, i32
  }
  func.func @transform_2(%arg0: i32, %arg1: i32, %arg2: i32) -> (i32, i32) {
    %c0_i32 = arith.constant 0 : i32
    %c0_i32_0 = arith.constant 0 : i32
    %c0_i32_1 = arith.constant 0 : i32
    return %c0_i32, %c0_i32_0 : i32, i32
  }
  func.func @transform_3(%arg0: i32, %arg1: i32, %arg2: i32) -> (i32, i32) {
    %c0_i32 = arith.constant 0 : i32
    %c0_i32_0 = arith.constant 0 : i32
    %c0_i32_1 = arith.constant 0 : i32
    return %c0_i32, %c0_i32_0 : i32, i32
  }
  func.func @transform_4(%arg0: i32, %arg1: i32, %arg2: i32) -> (i32, i32) {
    %c0_i32 = arith.constant 0 : i32
    %c0_i32_0 = arith.constant 0 : i32
    %c0_i32_1 = arith.constant 0 : i32
    return %c0_i32, %c0_i32_0 : i32, i32
  }
  func.func @transform_5(%arg0: i32, %arg1: i32, %arg2: i32) -> (i32, i32) {
    %c0_i32 = arith.constant 0 : i32
    %c0_i32_0 = arith.constant 0 : i32
    %c0_i32_1 = arith.constant 0 : i32
    return %c0_i32, %c0_i32_0 : i32, i32
  }
  func.func @transform_6(%arg0: i32, %arg1: i32, %arg2: i32) -> (i32, i32) {
    %0 = arith.muli %arg1, %arg0 : i32
    %c0_i32 = arith.constant 0 : i32
    %c0_i32_0 = arith.constant 0 : i32
    return %0, %c0_i32 : i32, i32
  }
}

</mosaic_0001>

<bundles_post_ra>
// kernel: tpu_custom_call.1
= control target key start
LH: loop header
LB: loop body
LE: loop exit
PB: predicated region body
PF: predicated region fallthrough
CT: control target
= control target key end

     0   :  { %11 = vsyncpa [#allocation7], 0  ;;  %s2599_s0 = inlined_call_operand.hbm [shape: bf16[128,128], index: 0, kind: input, shape index: {}]   ;;  %s2600_s1 = inlined_call_operand.hbm [shape: f32[128,128], index: 1, kind: input, shape index: {}]   ;;  %s2601_s2 = inlined_call_operand.hbm [shape: f32[128,128], index: 2, kind: input, shape index: {}]   ;;  %s2602_s3 = inlined_call_operand.vmem [shape: f32[1,128], index: 3, kind: input, shape index: {}]   ;;  %s2603_s4 = inlined_call_operand.hbm [shape: f32[128,128], index: 4, kind: input, shape index: {}]   ;;  %s2604_s5 = inlined_call_operand.vmem [shape: f32[1,128], index: 5, kind: input, shape index: {}]   ;;  %s2605_s6 = inlined_call_operand.hbm [shape: f32[128,128], index: 6, kind: output, shape index: {}]  }
   0x1   :  { %12 = vsyncpa [#allocation10], 0 }
   0x2   :  { %13 = vsyncpa [#allocation13], 0 }
   0x3   :  { %14 = vsyncpa [#allocation8], 0 }
   0x4   :  { %16 = vsyncpa [#allocation8 + $0x1], 0  ;;  %s2399_s21 = smov 0   ;;  %s2401_s22 = smov 0  }
   0x5   :  { %s2403_s23 = smov 0  }
   0x6 LB: > { %s2352_s24 = smov [#allocation9]   ;;  %s2609_s26 = sadd.s32 4294967295, %s2350_s23   ;;  %s2350_s23 = sphi %s2403_s23, %s22_s23   ;;  %s2346_s22 = sphi %s2401_s22, %s2622_s22   ;;  %s2342_s21 = sphi %s2399_s21, %s2621_s21  }
   0x7   : > { %s236_s25 = sshll.u32 %s2352_s24, 4  ;;  %p1524_p0 = scmp.ge.s32.totalorder %s2350_s23, 1  ;;  %s237_s25 = int_to_ptr.vmem [resolvable:$true] %s236_s25 }
   0x8   : > { %p207_p1 = scmp.lt.s32.totalorder %s2350_s23, 3  ;;  %p2420_p2 = scmp.eq.s32.totalorder %s2609_s26, 0 }
   0x9   : > { %s41_s7 = sadd.s32 1, %s2346_s22  ;;  %s2174_s11 = scalar_lea.hbm %s2600_s1, 2048 }
   0xa   : > { %s2610_s28 = scalar_select %p2420_p2, 1, 0 }
   0xb   : > { %p2424_p3 = pnand %p1524_p0, %p207_p1  ;;  %p2437_p6 = scmp.ge.s32.totalorder %s41_s7, 2 }
   0xc   : > { %p2175_p7 = scmp.ne.s32.totalorder %s2600_s1, %s2174_s11  ;;  %p2181_p11 = scmp.lt.u32.totalorder %s2174_s11, %s2600_s1 }
   0xd   : > { %s2611_s29 = scalar_select %p2424_p3, 1, 0 }
   0xe   : > { %p2094_p4 = pneg %p2424_p3 }
   0xf   : > { %s2613_s8 = scalar_select %p2437_p6, 1, 0 }
  0x10   : > { %p2432_p5 = pnand %p2420_p2, %p2094_p4 }
  0x12   : > { %p2449_p8 = pneg %p2432_p5 }
  0x14   : > { %p2177_p9 = pnand %p2449_p8, %p2175_p7 }
  0x16   : > { %p2178_p10 = pneg %p2177_p9 }
  0x18   : > { %p2183_p12 = pnand %p2181_p11, %p2178_p10 }
  0x1a   : > { %2186 = shalt.err (!%p2183_p12)
}
  0x1b   : > { %s2187_s17 = scalar_lea.vmem %s237_s25, 2048  ;;  %p2195_p4 = scmp.lt.s32.totalorder %s237_s25, %s237_s25 }
  0x1c   : > { %p2188_p13 = scmp.ne.s32.totalorder %s237_s25, %s2187_s17  ;;  %p2196_p2 = scmp.lt.s32.totalorder %s2187_s17, %s2187_s17 }
  0x1e   : > { %p2190_p0 = pnand %p2188_p13, %p2449_p8  ;;  %p2197_p3 = por %p2196_p2, %p2195_p4 }
  0x20   : > { %p2191_p1 = pneg %p2190_p0 }
  0x22   : > { %p2198_p6 = pnand %p2197_p3, %p2191_p1 }
  0x24   : > { %2201 = shalt.err (!%p2198_p6)
}
  0x25   : > { %s2353_s18 = smov 128   ;;  %s2354_s19 = smov 8  }
  0x26   : > { %2100 = dma.hbm_to_vmem [thread:$0]  (!%p2432_p5), %s2600_s1, 2048, %s237_s25, [#allocation10], %s2353_s18, %s2353_s18, %s2354_s19  }
  0x27   : > { %p2615_p7 = scmp.ne.s32.totalorder %s2613_s8, 0  ;;  %s2355_s9 = smov [#allocation6]  }
  0x28   : > { %s223_s10 = sshll.u32 %s2355_s9, 4  ;;  %s2202_s13 = scalar_lea.hbm %s2599_s0, 1024  ;;  %s224_s10 = int_to_ptr.vmem [resolvable:$true] %s223_s10 }
  0x29   : > { %s2624_s7 = smov (%p2615_p7, %s41_s7), 0  ;;  %p2203_p2 = scmp.ne.s32.totalorder %s2599_s0, %s2202_s13 }
  0x2a   : > { %p2209_p9 = scmp.lt.u32.totalorder %s2202_s13, %s2599_s0 }
  0x2b   : > { %p2205_p3 = pnand %p2203_p2, %p2449_p8 }
  0x2d   : > { %p2206_p6 = pneg %p2205_p3 }
  0x2f   : > { %p2211_p10 = pnand %p2209_p9, %p2206_p6 }
  0x31   : > { %2214 = shalt.err (!%p2211_p10)
}
  0x32   : > { %s2215_s25 = scalar_lea.vmem %s224_s10, 1024  ;;  %p2223_p0 = scmp.lt.s32.totalorder %s224_s10, %s224_s10 }
  0x33   : > { %p2216_p11 = scmp.ne.s32.totalorder %s224_s10, %s2215_s25  ;;  %p2224_p1 = scmp.lt.s32.totalorder %s2215_s25, %s2215_s25 }
  0x35   : > { %p2218_p12 = pnand %p2216_p11, %p2449_p8  ;;  %p2225_p4 = por %p2224_p1, %p2223_p0 }
  0x37   : > { %p2219_p13 = pneg %p2218_p12 }
  0x39   : > { %p2226_p7 = pnand %p2225_p4, %p2219_p13 }
  0x3b   : > { %2229 = shalt.err (!%p2226_p7)
}
  0x3c   : > { %s2356_s8 = smov 64   ;;  %s2357_s24 = smov 4  }
  0x3d   : > { %2097 = dma.hbm_to_vmem [thread:$0]  (!%p2432_p5), %s2599_s0, 1024, %s224_s10, [#allocation7], %s2356_s8, %s2356_s8, %s2357_s24  }
  0x3e   : > { %s2358_s12 = smov [#allocation11]   ;;  %s2359_s15 = smov [#allocation12]  }
  0x3f   : > { %s249_s13 = sshll.u32 %s2358_s12, 4  ;;  %s265_s16 = sshll.u32 %s2359_s15, 4  ;;  %s250_s13 = int_to_ptr.vmem [resolvable:$true] %s249_s13  ;;  %s2490_s16 = int_to_ptr.vmem [resolvable:$true] %s265_s16 }
  0x40   : > { %s2230_s25 = scalar_lea.hbm %s2601_s2, 2048 }
  0x41   : > { %p2231_p2 = scmp.ne.s32.totalorder %s2601_s2, %s2230_s25  ;;  %p2237_p9 = scmp.lt.u32.totalorder %s2230_s25, %s2601_s2 }
  0x43   : > { %p2233_p3 = pnand %p2231_p2, %p2449_p8 }
  0x45   : > { %p2234_p6 = pneg %p2233_p3 }
  0x47   : > { %p2239_p10 = pnand %p2237_p9, %p2234_p6 }
  0x49   : > { %2242 = shalt.err (!%p2239_p10)
}
  0x4a   : > { %s2243_s8 = scalar_lea.vmem %s250_s13, 2048  ;;  %p2251_p0 = scmp.lt.s32.totalorder %s250_s13, %s250_s13 }
  0x4b   : > { %p2244_p11 = scmp.ne.s32.totalorder %s250_s13, %s2243_s8  ;;  %p2252_p1 = scmp.lt.s32.totalorder %s2243_s8, %s2243_s8 }
  0x4d   : > { %p2246_p12 = pnand %p2244_p11, %p2449_p8  ;;  %p2253_p4 = por %p2252_p1, %p2251_p0 }
  0x4f   : > { %p2247_p13 = pneg %p2246_p12 }
  0x51   : > { %p2254_p7 = pnand %p2253_p4, %p2247_p13 }
  0x53   : > { %2257 = shalt.err (!%p2254_p7)
}
  0x54   : > { %2103 = dma.hbm_to_vmem [thread:$0]  (!%p2432_p5), %s2601_s2, 2048, %s250_s13, [#allocation10], %s2353_s18, %s2353_s18, %s2354_s19  }
  0x55   : > { %s2258_s12 = scalar_lea.hbm %s2603_s4, 2048 }
  0x56   : > { %p2259_p2 = scmp.ne.s32.totalorder %s2603_s4, %s2258_s12  ;;  %p2265_p9 = scmp.lt.u32.totalorder %s2258_s12, %s2603_s4 }
  0x58   : > { %p2261_p3 = pnand %p2259_p2, %p2449_p8 }
  0x5a   : > { %p2262_p6 = pneg %p2261_p3 }
  0x5c   : > { %p2267_p10 = pnand %p2265_p9, %p2262_p6 }
  0x5e   : > { %2270 = shalt.err (!%p2267_p10)
}
  0x5f   : > { %s2271_s13 = scalar_lea.vmem %s2490_s16, 2048  ;;  %p2279_p0 = scmp.lt.s32.totalorder %s2490_s16, %s2490_s16 }
  0x60   : > { %p2272_p11 = scmp.ne.s32.totalorder %s2490_s16, %s2271_s13  ;;  %p2280_p1 = scmp.lt.s32.totalorder %s2271_s13, %s2271_s13 }
  0x62   : > { %p2274_p12 = pnand %p2272_p11, %p2449_p8  ;;  %p2281_p4 = por %p2280_p1, %p2279_p0 }
  0x64   : > { %p2275_p13 = pneg %p2274_p12 }
  0x66   : > { %p2282_p7 = pnand %p2281_p4, %p2275_p13 }
  0x68   : > { %2285 = shalt.err (!%p2282_p7)
}
  0x69   : > { %2106 = dma.hbm_to_vmem [thread:$0]  (!%p2432_p5), %s2603_s4, 2048, %s2490_s16, [#allocation13], %s2353_s18, %s2353_s18, %s2354_s19  }
  0x6a   : > { %p2616_p2 = scmp.ne.s32.totalorder %s2611_s29, 0 }
  0x6b   : > { %p2617_p8 = scmp.ne.s32.totalorder (!%p2616_p2), %s2610_s28, 0 }
  0x6c   : > { %284 = sbr.rel (%p2616_p2) target bundleno = 1204 (0x4b4), region = 44 }
  0x73   : > { %2325 = dma.done.wait (%p2617_p8), [#allocation7], 1024  }
  0x74   : > { %2327 = vsyncadd (%p2617_p8), [#allocation7], 4294966272 }
  0x75   : > { %2329 = dma.done.wait (%p2617_p8), [#allocation10], 4096  }
  0x76   : > { %2331 = vsyncadd (%p2617_p8), [#allocation10], 4294963200 }
  0x77   : > { %2333 = dma.done.wait (%p2617_p8), [#allocation13], 2048  }
  0x78   : > { %2335 = vsyncadd (%p2617_p8), [#allocation13], 4294965248  ;;  %p327_p5 = scmp.eq.s32.totalorder %s2342_s21, 0 }
  0x79   : > { %v350_v0 = vld [vmem:[#allocation11] sm:$0xff] (%p327_p5)  ;;  %v351_v1 = vld [vmem:[#allocation11 + $0x8] sm:$0xff] (%p327_p5)  ;;  %v352_v2 = vld [vmem:[#allocation11 + $0x10] sm:$0xff] (%p327_p5) }
  0x7a   : > { %332 = sbr.rel (!%p327_p5) target bundleno = 384 (0x180), region = 64  ;;  %v1882_v3 = vpack.c.bf16 (%p327_p5), %v351_v1, %v350_v0  ;;  %v353_v4 = vld [vmem:[#allocation11 + $0x18] sm:$0xff] (%p327_p5)  ;;  %v354_v6 = vld [vmem:[#allocation11 + $0x20] sm:$0xff] (%p327_p5)  ;;  %v355_v7 = vld [vmem:[#allocation11 + $0x28] sm:$0xff] (%p327_p5) }
  0x7b   : > { %v1886_v5 = vpack.c.bf16 (%p327_p5), %v353_v4, %v352_v2  ;;  %v1890_v8 = vpack.c.bf16 (%p327_p5), %v355_v7, %v354_v6  ;;  %v334_v9 = vld [vmem:[#allocation9] sm:$0xff] (%p327_p5)  ;;  %v356_v11 = vld [vmem:[#allocation11 + $0x30] sm:$0xff] (%p327_p5)  ;;  %v357_v12 = vld [vmem:[#allocation11 + $0x38] sm:$0xff] (%p327_p5) }
  0x7c   : > { %1883 = vmatprep.subr.bf16.mxu0 (%p327_p5), %v1882_v3  ;;  %2010 = vmatprep.subr.bf16.mxu1 (%p327_p5), %v1882_v3  ;;  %v342_v10 = vld [vmem:[#allocation9 + $0x40] sm:$0xff] (%p327_p5)  ;;  %v1894_v13 = vpack.c.bf16 (%p327_p5), %v357_v12, %v356_v11  ;;  %v359_v15 = vld [vmem:[#allocation11 + $0x48] sm:$0xff] (%p327_p5)  ;;  %v360_v17 = vld [vmem:[#allocation11 + $0x50] sm:$0xff] (%p327_p5) }
  0x7d   : > { %1885 = vmatpush3.bf16.msra.mxu0 (%p327_p5), %v1882_v3  ;;  %2018 = vmatpush3.bf16.msra.mxu1 (%p327_p5), %v1882_v3  ;;  %v358_v14 = vld [vmem:[#allocation11 + $0x40] sm:$0xff] (%p327_p5)  ;;  %v361_v18 = vld [vmem:[#allocation11 + $0x58] sm:$0xff] (%p327_p5)  ;;  %v363_v21 = vld [vmem:[#allocation11 + $0x68] sm:$0xff] (%p327_p5) }
  0x7e   : > { %1887 = vmatprep.subr.bf16.mxu0 (%p327_p5), %v1886_v5  ;;  %2011 = vmatprep.subr.bf16.mxu1 (%p327_p5), %v1886_v5  ;;  %v1898_v16 = vpack.c.bf16 (%p327_p5), %v359_v15, %v358_v14  ;;  %v1902_v19 = vpack.c.bf16 (%p327_p5), %v361_v18, %v360_v17  ;;  %v362_v20 = vld [vmem:[#allocation11 + $0x60] sm:$0xff] (%p327_p5)  ;;  %v364_v23 = vld [vmem:[#allocation11 + $0x70] sm:$0xff] (%p327_p5)  ;;  %v365_v24 = vld [vmem:[#allocation11 + $0x78] sm:$0xff] (%p327_p5) }
  0x7f   : > { %1706 = vmatprep.mubr.f32.mxu0 (%p327_p5), %v334_v9  ;;  %1718 = vmatprep.mubr.f32.mxu1 (%p327_p5), %v342_v10  ;;  %v1906_v22 = vpack.c.bf16 (%p327_p5), %v363_v21, %v362_v20  ;;  %v1910_v25 = vpack.c.bf16 (%p327_p5), %v365_v24, %v364_v23  ;;  %v335_v26 = vld [vmem:[#allocation9 + $0x8] sm:$0xff] (%p327_p5)  ;;  %v336_v28 = vld [vmem:[#allocation9 + $0x10] sm:$0xff] (%p327_p5)  ;;  %v337_v30 = vld [vmem:[#allocation9 + $0x18] sm:$0xff] (%p327_p5) }
  0x80   : > { %v343_v27 = vld [vmem:[#allocation9 + $0x48] sm:$0xff] (%p327_p5)  ;;  %v344_v29 = vld [vmem:[#allocation9 + $0x50] sm:$0xff] (%p327_p5)  ;;  %v345_v31 = vld [vmem:[#allocation9 + $0x58] sm:$0xff] (%p327_p5) }
  0x81   : > { %1889 = vmatpush3.bf16.msra.mxu0 %v1886_v5  ;;  %2019 = vmatpush3.bf16.msra.mxu1 %v1886_v5  ;;  %v338_v32 = vld [vmem:[#allocation9 + $0x20] sm:$0xff]  ;;  %v339_v34 = vld [vmem:[#allocation9 + $0x28] sm:$0xff]  ;;  %v340_v36 = vld [vmem:[#allocation9 + $0x30] sm:$0xff] }
  0x82   : > { %1891 = vmatprep.subr.bf16.mxu0 %v1890_v8  ;;  %2012 = vmatprep.subr.bf16.mxu1 %v1890_v8  ;;  %v346_v33 = vld [vmem:[#allocation9 + $0x60] sm:$0xff]  ;;  %v347_v35 = vld [vmem:[#allocation9 + $0x68] sm:$0xff]  ;;  %v348_v37 = vld [vmem:[#allocation9 + $0x70] sm:$0xff] }
  0x83   : > { %v341_v38 = vld [vmem:[#allocation9 + $0x38] sm:$0xff]  ;;  %v1535_v40 = vld [vmem:[%s2602_s3] ss:$0 sm:$0xff] }
  0x84   : > { %v349_v39 = vld [vmem:[#allocation9 + $0x78] sm:$0xff] }
  0x85   : > { %1893 = vmatpush3.bf16.msra.mxu0 %v1890_v8  ;;  %2020 = vmatpush3.bf16.msra.mxu1 %v1890_v8 }
  0x86   : > { %1895 = vmatprep.subr.bf16.mxu0 %v1894_v13  ;;  %2013 = vmatprep.subr.bf16.mxu1 %v1894_v13 }
  0x89   : > { %1897 = vmatpush3.bf16.msra.mxu0 %v1894_v13  ;;  %2021 = vmatpush3.bf16.msra.mxu1 %v1894_v13 }
  0x8a   : > { %1899 = vmatprep.subr.bf16.mxu0 %v1898_v16  ;;  %2014 = vmatprep.subr.bf16.mxu1 %v1898_v16 }
  0x8d   : > { %1901 = vmatpush3.bf16.msra.mxu0 %v1898_v16  ;;  %2022 = vmatpush3.bf16.msra.mxu1 %v1898_v16 }
  0x8e   : > { %1903 = vmatprep.subr.bf16.mxu0 %v1902_v19  ;;  %2015 = vmatprep.subr.bf16.mxu1 %v1902_v19 }
  0x91   : > { %1905 = vmatpush3.bf16.msra.mxu0 %v1902_v19  ;;  %2023 = vmatpush3.bf16.msra.mxu1 %v1902_v19 }
  0x92   : > { %1907 = vmatprep.subr.bf16.mxu0 %v1906_v22  ;;  %2016 = vmatprep.subr.bf16.mxu1 %v1906_v22 }
  0x95   : > { %1909 = vmatpush3.bf16.msra.mxu0 %v1906_v22  ;;  %2024 = vmatpush3.bf16.msra.mxu1 %v1906_v22 }
  0x96   : > { %1911 = vmatprep.subr.bf16.mxu0 %v1910_v25  ;;  %2017 = vmatprep.subr.bf16.mxu1 %v1910_v25 }
  0x99   : > { %1913 = vmatpush3.bf16.msra.mxu0 %v1910_v25  ;;  %2025 = vmatpush3.bf16.msra.mxu1 %v1910_v25 }
  0x9c   : > { %1707 = vmatmul.mubr.f32.vlgmr.msra.gmra.mrb[0].mxu0 %v335_v26  ;;  %1719 = vmatmul.mubr.f32.vlgmr.msra.gmra.mrb[0].mxu1 %v343_v27 }
  0x9d   : > { %1709 = vmatprep.mubr.f32.mxu0 %v336_v28  ;;  %1721 = vmatprep.mubr.f32.mxu1 %v344_v29 }
  0xa0   : > { %1710 = vmatmul.mubr.f32.gmra.mrb[2].mxu0 %v337_v30  ;;  %1722 = vmatmul.mubr.f32.gmra.mrb[2].mxu1 %v345_v31 }
  0xa1   : > { %1712 = vmatprep.mubr.f32.mxu0 %v338_v32  ;;  %1724 = vmatprep.mubr.f32.mxu1 %v346_v33 }
  0xa4   : > { %1713 = vmatmul.mubr.f32.gmra.mrb[4].mxu0 %v339_v34  ;;  %1725 = vmatmul.mubr.f32.gmra.mrb[4].mxu1 %v347_v35 }
  0xa5   : > { %1715 = vmatprep.mubr.f32.mxu0 %v340_v36  ;;  %1727 = vmatprep.mubr.f32.mxu1 %v348_v37 }
  0xa8   : > { %1716 = vmatmul.mubr.f32.gmra.mrb[6].mxu0 %v341_v38  ;;  %1728 = vmatmul.mubr.f32.gmra.mrb[6].mxu1 %v349_v39 }
 0x16f   : > { %v1708_v41 = vpop.f32.mrb[0].mxu0  ;;  %v1720_v42 = vpop.f32.mrb[0].mxu1 }
 0x170   : > { %v445_v43 = vadd.f32 %v1708_v41, %v1535_v40  ;;  %v485_v44 = vadd.f32 %v1720_v42, %v1535_v40  ;;  %v439_v45 = vpop.f32.mrb[1].mxu0  ;;  %v479_v46 = vpop.f32.mrb[1].mxu1 }
 0x171   : > { %v440_v47 = vadd.f32 %v1535_v40, %v439_v45  ;;  %v480_v48 = vadd.f32 %v1535_v40, %v479_v46 }
 0x172   : > { %520 = vst [vmem:[#allocation2 + $0x8] sm:$0xff] %v445_v43  ;;  %528 = vst [vmem:[#allocation2 + $0x48] sm:$0xff] %v485_v44 }
 0x173   : > { %519 = vst [vmem:[#allocation2] sm:$0xff] %v440_v47  ;;  %527 = vst [vmem:[#allocation2 + $0x40] sm:$0xff] %v480_v48  ;;  %v1711_v49 = vpop.f32.mrb[2].mxu0  ;;  %v1723_v50 = vpop.f32.mrb[2].mxu1 }
 0x174   : > { %v455_v51 = vadd.f32 %v1711_v49, %v1535_v40  ;;  %v495_v52 = vadd.f32 %v1723_v50, %v1535_v40  ;;  %v449_v53 = vpop.f32.mrb[3].mxu0  ;;  %v489_v54 = vpop.f32.mrb[3].mxu1 }
 0x175   : > { %v450_v55 = vadd.f32 %v1535_v40, %v449_v53  ;;  %v490_v56 = vadd.f32 %v1535_v40, %v489_v54 }
 0x176   : > { %522 = vst [vmem:[#allocation2 + $0x18] sm:$0xff] %v455_v51  ;;  %530 = vst [vmem:[#allocation2 + $0x58] sm:$0xff] %v495_v52 }
 0x177   : > { %521 = vst [vmem:[#allocation2 + $0x10] sm:$0xff] %v450_v55  ;;  %529 = vst [vmem:[#allocation2 + $0x50] sm:$0xff] %v490_v56  ;;  %v1714_v57 = vpop.f32.mrb[4].mxu0  ;;  %v1726_v58 = vpop.f32.mrb[4].mxu1 }
 0x178   : > { %v465_v59 = vadd.f32 %v1714_v57, %v1535_v40  ;;  %v505_v60 = vadd.f32 %v1726_v58, %v1535_v40  ;;  %v459_v61 = vpop.f32.mrb[5].mxu0  ;;  %v499_v62 = vpop.f32.mrb[5].mxu1 }
 0x179   : > { %v460_v63 = vadd.f32 %v1535_v40, %v459_v61  ;;  %v500_v0 = vadd.f32 %v1535_v40, %v499_v62 }
 0x17a   : > { %524 = vst [vmem:[#allocation2 + $0x28] sm:$0xff] %v465_v59  ;;  %532 = vst [vmem:[#allocation2 + $0x68] sm:$0xff] %v505_v60 }
 0x17b   : > { %523 = vst [vmem:[#allocation2 + $0x20] sm:$0xff] %v460_v63  ;;  %531 = vst [vmem:[#allocation2 + $0x60] sm:$0xff] %v500_v0  ;;  %v1717_v1 = vpop.f32.mrb[6].mxu0  ;;  %v1729_v2 = vpop.f32.mrb[6].mxu1 }
 0x17c   : > { %v475_v3 = vadd.f32 %v1717_v1, %v1535_v40  ;;  %v515_v4 = vadd.f32 %v1729_v2, %v1535_v40  ;;  %v469_v5 = vpop.f32.mrb[7].mxu0  ;;  %v509_v6 = vpop.f32.mrb[7].mxu1 }
 0x17d   : > { %v470_v7 = vadd.f32 %v1535_v40, %v469_v5  ;;  %v510_v8 = vadd.f32 %v1535_v40, %v509_v6 }
 0x17e   : > { %526 = vst [vmem:[#allocation2 + $0x38] sm:$0xff] %v475_v3  ;;  %534 = vst [vmem:[#allocation2 + $0x78] sm:$0xff] %v515_v4 }
 0x17f   : > { %525 = vst [vmem:[#allocation2 + $0x30] sm:$0xff] %v470_v7  ;;  %533 = vst [vmem:[#allocation2 + $0x70] sm:$0xff] %v510_v8 }
 0x180 PF: > { %p535_p3 = scmp.eq.s32.totalorder %s2342_s21, 1 }
 0x181   : > { %v557_v9 = vld [vmem:[#allocation12] sm:$0xff] (%p535_p3)  ;;  %v558_v10 = vld [vmem:[#allocation12 + $0x8] sm:$0xff] (%p535_p3)  ;;  %v559_v11 = vld [vmem:[#allocation12 + $0x10] sm:$0xff] (%p535_p3) }
 0x182   : > { %539 = sbr.rel (!%p535_p3) target bundleno = 648 (0x288), region = 68  ;;  %v1914_v12 = vpack.c.bf16 (%p535_p3), %v558_v10, %v557_v9  ;;  %v560_v13 = vld [vmem:[#allocation12 + $0x18] sm:$0xff] (%p535_p3)  ;;  %v561_v15 = vld [vmem:[#allocation12 + $0x20] sm:$0xff] (%p535_p3)  ;;  %v562_v16 = vld [vmem:[#allocation12 + $0x28] sm:$0xff] (%p535_p3) }
 0x183   : > { %v1918_v14 = vpack.c.bf16 (%p535_p3), %v560_v13, %v559_v11  ;;  %v1922_v17 = vpack.c.bf16 (%p535_p3), %v562_v16, %v561_v15  ;;  %v541_v18 = vld [vmem:[#allocation3] sm:$0xff] (%p535_p3)  ;;  %v563_v20 = vld [vmem:[#allocation12 + $0x30] sm:$0xff] (%p535_p3)  ;;  %v564_v21 = vld [vmem:[#allocation12 + $0x38] sm:$0xff] (%p535_p3) }
 0x184   : > { %1915 = vmatprep.subr.bf16.mxu0 (%p535_p3), %v1914_v12  ;;  %2026 = vmatprep.subr.bf16.mxu1 (%p535_p3), %v1914_v12  ;;  %v549_v19 = vld [vmem:[#allocation3 + $0x40] sm:$0xff] (%p535_p3)  ;;  %v1926_v22 = vpack.c.bf16 (%p535_p3), %v564_v21, %v563_v20  ;;  %v566_v24 = vld [vmem:[#allocation12 + $0x48] sm:$0xff] (%p535_p3)  ;;  %v567_v26 = vld [vmem:[#allocation12 + $0x50] sm:$0xff] (%p535_p3) }
 0x185   : > { %1917 = vmatpush3.bf16.msra.mxu0 (%p535_p3), %v1914_v12  ;;  %2034 = vmatpush3.bf16.msra.mxu1 (%p535_p3), %v1914_v12  ;;  %v565_v23 = vld [vmem:[#allocation12 + $0x40] sm:$0xff] (%p535_p3)  ;;  %v568_v27 = vld [vmem:[#allocation12 + $0x58] sm:$0xff] (%p535_p3)  ;;  %v570_v30 = vld [vmem:[#allocation12 + $0x68] sm:$0xff] (%p535_p3) }
 0x186   : > { %1919 = vmatprep.subr.bf16.mxu0 (%p535_p3), %v1918_v14  ;;  %2027 = vmatprep.subr.bf16.mxu1 (%p535_p3), %v1918_v14  ;;  %v1930_v25 = vpack.c.bf16 (%p535_p3), %v566_v24, %v565_v23  ;;  %v1934_v28 = vpack.c.bf16 (%p535_p3), %v568_v27, %v567_v26  ;;  %v569_v29 = vld [vmem:[#allocation12 + $0x60] sm:$0xff] (%p535_p3)  ;;  %v571_v32 = vld [vmem:[#allocation12 + $0x70] sm:$0xff] (%p535_p3)  ;;  %v572_v33 = vld [vmem:[#allocation12 + $0x78] sm:$0xff] (%p535_p3) }
 0x187   : > { %1762 = vmatprep.mubr.f32.mxu0 (%p535_p3), %v541_v18  ;;  %1774 = vmatprep.mubr.f32.mxu1 (%p535_p3), %v549_v19  ;;  %v1938_v31 = vpack.c.bf16 (%p535_p3), %v570_v30, %v569_v29  ;;  %v1942_v34 = vpack.c.bf16 (%p535_p3), %v572_v33, %v571_v32  ;;  %v542_v35 = vld [vmem:[#allocation3 + $0x8] sm:$0xff] (%p535_p3)  ;;  %v543_v37 = vld [vmem:[#allocation3 + $0x10] sm:$0xff] (%p535_p3)  ;;  %v544_v39 = vld [vmem:[#allocation3 + $0x18] sm:$0xff] (%p535_p3) }
 0x188   : > { %v550_v36 = vld [vmem:[#allocation3 + $0x48] sm:$0xff] (%p535_p3)  ;;  %v551_v38 = vld [vmem:[#allocation3 + $0x50] sm:$0xff] (%p535_p3)  ;;  %v552_v40 = vld [vmem:[#allocation3 + $0x58] sm:$0xff] (%p535_p3) }
 0x189   : > { %1921 = vmatpush3.bf16.msra.mxu0 %v1918_v14  ;;  %2035 = vmatpush3.bf16.msra.mxu1 %v1918_v14  ;;  %v545_v41 = vld [vmem:[#allocation3 + $0x20] sm:$0xff]  ;;  %v546_v43 = vld [vmem:[#allocation3 + $0x28] sm:$0xff]  ;;  %v547_v45 = vld [vmem:[#allocation3 + $0x30] sm:$0xff] }
 0x18a   : > { %1923 = vmatprep.subr.bf16.mxu0 %v1922_v17  ;;  %2028 = vmatprep.subr.bf16.mxu1 %v1922_v17  ;;  %v553_v42 = vld [vmem:[#allocation3 + $0x60] sm:$0xff]  ;;  %v554_v44 = vld [vmem:[#allocation3 + $0x68] sm:$0xff]  ;;  %v555_v46 = vld [vmem:[#allocation3 + $0x70] sm:$0xff] }
 0x18b   : > { %v548_v47 = vld [vmem:[#allocation3 + $0x38] sm:$0xff]  ;;  %v1537_v49 = vld [vmem:[%s2604_s5] ss:$0 sm:$0xff] }
 0x18c   : > { %v556_v48 = vld [vmem:[#allocation3 + $0x78] sm:$0xff] }
 0x18d   : > { %1925 = vmatpush3.bf16.msra.mxu0 %v1922_v17  ;;  %2036 = vmatpush3.bf16.msra.mxu1 %v1922_v17 }
 0x18e   : > { %1927 = vmatprep.subr.bf16.mxu0 %v1926_v22  ;;  %2029 = vmatprep.subr.bf16.mxu1 %v1926_v22 }
 0x191   : > { %1929 = vmatpush3.bf16.msra.mxu0 %v1926_v22  ;;  %2037 = vmatpush3.bf16.msra.mxu1 %v1926_v22 }
 0x192   : > { %1931 = vmatprep.subr.bf16.mxu0 %v1930_v25  ;;  %2030 = vmatprep.subr.bf16.mxu1 %v1930_v25 }
 0x195   : > { %1933 = vmatpush3.bf16.msra.mxu0 %v1930_v25  ;;  %2038 = vmatpush3.bf16.msra.mxu1 %v1930_v25 }
 0x196   : > { %1935 = vmatprep.subr.bf16.mxu0 %v1934_v28  ;;  %2031 = vmatprep.subr.bf16.mxu1 %v1934_v28 }
 0x199   : > { %1937 = vmatpush3.bf16.msra.mxu0 %v1934_v28  ;;  %2039 = vmatpush3.bf16.msra.mxu1 %v1934_v28 }
 0x19a   : > { %1939 = vmatprep.subr.bf16.mxu0 %v1938_v31  ;;  %2032 = vmatprep.subr.bf16.mxu1 %v1938_v31 }
 0x19d   : > { %1941 = vmatpush3.bf16.msra.mxu0 %v1938_v31  ;;  %2040 = vmatpush3.bf16.msra.mxu1 %v1938_v31 }
 0x19e   : > { %1943 = vmatprep.subr.bf16.mxu0 %v1942_v34  ;;  %2033 = vmatprep.subr.bf16.mxu1 %v1942_v34 }
 0x1a1   : > { %1945 = vmatpush3.bf16.msra.mxu0 %v1942_v34  ;;  %2041 = vmatpush3.bf16.msra.mxu1 %v1942_v34 }
 0x1a4   : > { %1763 = vmatmul.mubr.f32.vlgmr.msra.gmra.mrb[0].mxu0 %v542_v35  ;;  %1775 = vmatmul.mubr.f32.vlgmr.msra.gmra.mrb[0].mxu1 %v550_v36 }
 0x1a5   : > { %1765 = vmatprep.mubr.f32.mxu0 %v543_v37  ;;  %1777 = vmatprep.mubr.f32.mxu1 %v551_v38 }
 0x1a8   : > { %1766 = vmatmul.mubr.f32.gmra.mrb[2].mxu0 %v544_v39  ;;  %1778 = vmatmul.mubr.f32.gmra.mrb[2].mxu1 %v552_v40 }
 0x1a9   : > { %1768 = vmatprep.mubr.f32.mxu0 %v545_v41  ;;  %1780 = vmatprep.mubr.f32.mxu1 %v553_v42 }
 0x1ac   : > { %1769 = vmatmul.mubr.f32.gmra.mrb[4].mxu0 %v546_v43  ;;  %1781 = vmatmul.mubr.f32.gmra.mrb[4].mxu1 %v554_v44 }
 0x1ad   : > { %1771 = vmatprep.mubr.f32.mxu0 %v547_v45  ;;  %1783 = vmatprep.mubr.f32.mxu1 %v555_v46 }
 0x1b0   : > { %1772 = vmatmul.mubr.f32.gmra.mrb[6].mxu0 %v548_v47  ;;  %1784 = vmatmul.mubr.f32.gmra.mrb[6].mxu1 %v556_v48 }
 0x277   : > { %v1764_v50 = vpop.f32.mrb[0].mxu0  ;;  %v1776_v51 = vpop.f32.mrb[0].mxu1 }
 0x278   : > { %v652_v52 = vadd.f32 %v1764_v50, %v1537_v49  ;;  %v692_v53 = vadd.f32 %v1776_v51, %v1537_v49  ;;  %v646_v54 = vpop.f32.mrb[1].mxu0  ;;  %v686_v55 = vpop.f32.mrb[1].mxu1 }
 0x279   : > { %v647_v56 = vadd.f32 %v1537_v49, %v646_v54  ;;  %v687_v57 = vadd.f32 %v1537_v49, %v686_v55 }
 0x27a   : > { %727 = vst [vmem:[#allocation4 + $0x8] sm:$0xff] %v652_v52  ;;  %735 = vst [vmem:[#allocation4 + $0x48] sm:$0xff] %v692_v53 }
 0x27b   : > { %726 = vst [vmem:[#allocation4] sm:$0xff] %v647_v56  ;;  %734 = vst [vmem:[#allocation4 + $0x40] sm:$0xff] %v687_v57  ;;  %v1767_v58 = vpop.f32.mrb[2].mxu0  ;;  %v1779_v59 = vpop.f32.mrb[2].mxu1 }
 0x27c   : > { %v662_v60 = vadd.f32 %v1767_v58, %v1537_v49  ;;  %v702_v61 = vadd.f32 %v1779_v59, %v1537_v49  ;;  %v656_v62 = vpop.f32.mrb[3].mxu0  ;;  %v696_v63 = vpop.f32.mrb[3].mxu1 }
 0x27d   : > { %v657_v0 = vadd.f32 %v1537_v49, %v656_v62  ;;  %v697_v1 = vadd.f32 %v1537_v49, %v696_v63 }
 0x27e   : > { %729 = vst [vmem:[#allocation4 + $0x18] sm:$0xff] %v662_v60  ;;  %737 = vst [vmem:[#allocation4 + $0x58] sm:$0xff] %v702_v61 }
 0x27f   : > { %728 = vst [vmem:[#allocation4 + $0x10] sm:$0xff] %v657_v0  ;;  %736 = vst [vmem:[#allocation4 + $0x50] sm:$0xff] %v697_v1  ;;  %v1770_v2 = vpop.f32.mrb[4].mxu0  ;;  %v1782_v3 = vpop.f32.mrb[4].mxu1 }
 0x280   : > { %v672_v4 = vadd.f32 %v1770_v2, %v1537_v49  ;;  %v712_v5 = vadd.f32 %v1782_v3, %v1537_v49  ;;  %v666_v6 = vpop.f32.mrb[5].mxu0  ;;  %v706_v7 = vpop.f32.mrb[5].mxu1 }
 0x281   : > { %v667_v8 = vadd.f32 %v1537_v49, %v666_v6  ;;  %v707_v9 = vadd.f32 %v1537_v49, %v706_v7 }
 0x282   : > { %731 = vst [vmem:[#allocation4 + $0x28] sm:$0xff] %v672_v4  ;;  %739 = vst [vmem:[#allocation4 + $0x68] sm:$0xff] %v712_v5 }
 0x283   : > { %730 = vst [vmem:[#allocation4 + $0x20] sm:$0xff] %v667_v8  ;;  %738 = vst [vmem:[#allocation4 + $0x60] sm:$0xff] %v707_v9  ;;  %v1773_v10 = vpop.f32.mrb[6].mxu0  ;;  %v1785_v11 = vpop.f32.mrb[6].mxu1 }
 0x284   : > { %v682_v12 = vadd.f32 %v1773_v10, %v1537_v49  ;;  %v722_v13 = vadd.f32 %v1785_v11, %v1537_v49  ;;  %v676_v14 = vpop.f32.mrb[7].mxu0  ;;  %v716_v15 = vpop.f32.mrb[7].mxu1 }
 0x285   : > { %v677_v16 = vadd.f32 %v1537_v49, %v676_v14  ;;  %v717_v17 = vadd.f32 %v1537_v49, %v716_v15 }
 0x286   : > { %733 = vst [vmem:[#allocation4 + $0x38] sm:$0xff] %v682_v12  ;;  %741 = vst [vmem:[#allocation4 + $0x78] sm:$0xff] %v722_v13 }
 0x287   : > { %732 = vst [vmem:[#allocation4 + $0x30] sm:$0xff] %v677_v16  ;;  %740 = vst [vmem:[#allocation4 + $0x70] sm:$0xff] %v717_v17 }
 0x288 PF: > { %v2360_v18 = vmov 0.0   ;;  %p1538_p6 = scmp.ne.s32.totalorder %s2342_s21, 0 }
 0x289   : > { %746 = vst [vmem:[#allocation5] sm:$0xff] %v2360_v18  ;;  %747 = vst [vmem:[#allocation5 + $0x8] sm:$0xff] %v2360_v18  ;;  %v798_v19 = vld [vmem:[#allocation2] sm:$0xff] (!%p1538_p6)  ;;  %v799_v20 = vld [vmem:[#allocation2 + $0x8] sm:$0xff] (!%p1538_p6) }
 0x28a   : > { %748 = vst [vmem:[#allocation5 + $0x10] sm:$0xff] %v2360_v18  ;;  %749 = vst [vmem:[#allocation5 + $0x18] sm:$0xff] %v2360_v18  ;;  %764 = sbr.rel (%p1538_p6) target bundleno = 914 (0x392), region = 76  ;;  %v800_v21 = vld [vmem:[#allocation2 + $0x10] sm:$0xff] (!%p1538_p6)  ;;  %v1946_v22 = vpack.c.bf16 (!%p1538_p6), %v799_v20, %v798_v19  ;;  %v801_v23 = vld [vmem:[#allocation2 + $0x18] sm:$0xff] (!%p1538_p6) }
 0x28b   : > { %750 = vst [vmem:[#allocation5 + $0x20] sm:$0xff] %v2360_v18  ;;  %751 = vst [vmem:[#allocation5 + $0x28] sm:$0xff] %v2360_v18  ;;  %v1950_v24 = vpack.c.bf16 (!%p1538_p6), %v801_v23, %v800_v21  ;;  %v802_v25 = vld [vmem:[#allocation2 + $0x20] sm:$0xff] (!%p1538_p6)  ;;  %v803_v26 = vld [vmem:[#allocation2 + $0x28] sm:$0xff] (!%p1538_p6) }
 0x28c   : > { %752 = vst [vmem:[#allocation5 + $0x30] sm:$0xff] %v2360_v18  ;;  %753 = vst [vmem:[#allocation5 + $0x38] sm:$0xff] %v2360_v18  ;;  %1947 = vmatprep.subr.bf16.mxu0 (!%p1538_p6), %v1946_v22  ;;  %2042 = vmatprep.subr.bf16.mxu1 (!%p1538_p6), %v1946_v22  ;;  %v804_v27 = vld [vmem:[#allocation2 + $0x30] sm:$0xff] (!%p1538_p6)  ;;  %v1954_v28 = vpack.c.bf16 (!%p1538_p6), %v803_v26, %v802_v25  ;;  %v805_v29 = vld [vmem:[#allocation2 + $0x38] sm:$0xff] (!%p1538_p6) }
 0x28d   : > { %754 = vst [vmem:[#allocation5 + $0x40] sm:$0xff] %v2360_v18  ;;  %755 = vst [vmem:[#allocation5 + $0x48] sm:$0xff] %v2360_v18  ;;  %1949 = vmatpush3.bf16.msra.mxu0 (!%p1538_p6), %v1946_v22  ;;  %2050 = vmatpush3.bf16.msra.mxu1 (!%p1538_p6), %v1946_v22  ;;  %v2158_v30 = vld [vmem:[#allocation6] sm:$0xff] (!%p1538_p6)   ;;  %v1958_v32 = vpack.c.bf16 (!%p1538_p6), %v805_v29, %v804_v27  ;;  %v807_v34 = vld [vmem:[#allocation2 + $0x48] sm:$0xff] (!%p1538_p6) }
 0x28e   : > { %756 = vst [vmem:[#allocation5 + $0x50] sm:$0xff] %v2360_v18  ;;  %757 = vst [vmem:[#allocation5 + $0x58] sm:$0xff] %v2360_v18  ;;  %1951 = vmatprep.subr.bf16.mxu0 (!%p1538_p6), %v1950_v24  ;;  %2043 = vmatprep.subr.bf16.mxu1 (!%p1538_p6), %v1950_v24  ;;  %v2159_v31 = vld [vmem:[#allocation6 + $0x20] sm:$0xff] (!%p1538_p6)   ;;  %v808_v36 = vld [vmem:[#allocation2 + $0x50] sm:$0xff] (!%p1538_p6) }
 0x28f   : > { %758 = vst [vmem:[#allocation5 + $0x60] sm:$0xff] %v2360_v18  ;;  %759 = vst [vmem:[#allocation5 + $0x68] sm:$0xff] %v2360_v18  ;;  %v806_v33 = vld [vmem:[#allocation2 + $0x40] sm:$0xff] (!%p1538_p6)  ;;  %1818 = vmatprep.mubr.bf16.mxu0 (!%p1538_p6), %v2158_v30  ;;  %1826 = vmatprep.mubr.bf16.mxu1 (!%p1538_p6), %v2159_v31  ;;  %v809_v37 = vld [vmem:[#allocation2 + $0x58] sm:$0xff] (!%p1538_p6) }
 0x290   : > { %760 = vst [vmem:[#allocation5 + $0x70] sm:$0xff] %v2360_v18  ;;  %761 = vst [vmem:[#allocation5 + $0x78] sm:$0xff] %v2360_v18  ;;  %v1962_v35 = vpack.c.bf16 (!%p1538_p6), %v807_v34, %v806_v33  ;;  %v1966_v38 = vpack.c.bf16 (!%p1538_p6), %v809_v37, %v808_v36  ;;  %v810_v39 = vld [vmem:[#allocation2 + $0x60] sm:$0xff] (!%p1538_p6)  ;;  %v811_v40 = vld [vmem:[#allocation2 + $0x68] sm:$0xff] (!%p1538_p6) }
 0x291   : > { %1953 = vmatpush3.bf16.msra.mxu0 %v1950_v24  ;;  %2051 = vmatpush3.bf16.msra.mxu1 %v1950_v24  ;;  %v1970_v41 = vpack.c.bf16 %v811_v40, %v810_v39  ;;  %v812_v42 = vld [vmem:[#allocation2 + $0x70] sm:$0xff]  ;;  %v813_v43 = vld [vmem:[#allocation2 + $0x78] sm:$0xff]  ;;  %v2160_v45 = vld [vmem:[#allocation6 + $0x8] sm:$0xff]  }
 0x292   : > { %1955 = vmatprep.subr.bf16.mxu0 %v1954_v28  ;;  %2044 = vmatprep.subr.bf16.mxu1 %v1954_v28  ;;  %v1974_v44 = vpack.c.bf16 %v813_v43, %v812_v42  ;;  %v2161_v46 = vld [vmem:[#allocation6 + $0x28] sm:$0xff]   ;;  %v2162_v47 = vld [vmem:[#allocation6 + $0x10] sm:$0xff]   ;;  %v2164_v49 = vld [vmem:[#allocation6 + $0x18] sm:$0xff]  }
 0x293   : > { %v2163_v48 = vld [vmem:[#allocation6 + $0x30] sm:$0xff]   ;;  %v2165_v50 = vld [vmem:[#allocation6 + $0x38] sm:$0xff]   ;;  %v765_v53 = vld [vmem:[#allocation5] sm:$0xff] }
 0x294   : > { %v767_v51 = vld [vmem:[#allocation5 + $0x10] sm:$0xff]  ;;  %v773_v54 = vld [vmem:[#allocation5 + $0x40] sm:$0xff]  ;;  %v768_v57 = vld [vmem:[#allocation5 + $0x18] sm:$0xff] }
 0x295   : > { %1957 = vmatpush3.bf16.msra.mxu0 %v1954_v28  ;;  %2052 = vmatpush3.bf16.msra.mxu1 %v1954_v28  ;;  %v775_v52 = vld [vmem:[#allocation5 + $0x50] sm:$0xff]  ;;  %v776_v58 = vld [vmem:[#allocation5 + $0x58] sm:$0xff]  ;;  %v766_v63 = vld [vmem:[#allocation5 + $0x8] sm:$0xff] }
 0x296   : > { %1959 = vmatprep.subr.bf16.mxu0 %v1958_v32  ;;  %2045 = vmatprep.subr.bf16.mxu1 %v1958_v32  ;;  %v774_v0 = vld [vmem:[#allocation5 + $0x48] sm:$0xff]  ;;  %v771_v19 = vld [vmem:[#allocation5 + $0x30] sm:$0xff]  ;;  %v769_v21 = vld [vmem:[#allocation5 + $0x20] sm:$0xff] }
 0x297   : > { %v779_v20 = vld [vmem:[#allocation5 + $0x70] sm:$0xff]  ;;  %v777_v22 = vld [vmem:[#allocation5 + $0x60] sm:$0xff]  ;;  %v772_v25 = vld [vmem:[#allocation5 + $0x38] sm:$0xff] }
 0x298   : > { %v780_v26 = vld [vmem:[#allocation5 + $0x78] sm:$0xff]  ;;  %v770_v31 = vld [vmem:[#allocation5 + $0x28] sm:$0xff] }
 0x299   : > { %1961 = vmatpush3.bf16.msra.mxu0 %v1958_v32  ;;  %2053 = vmatpush3.bf16.msra.mxu1 %v1958_v32  ;;  %v778_v32 = vld [vmem:[#allocation5 + $0x68] sm:$0xff] }
 0x29a   : > { %1963 = vmatprep.subr.bf16.mxu0 %v1962_v35  ;;  %2046 = vmatprep.subr.bf16.mxu1 %v1962_v35 }
 0x29d   : > { %1965 = vmatpush3.bf16.msra.mxu0 %v1962_v35  ;;  %2054 = vmatpush3.bf16.msra.mxu1 %v1962_v35 }
 0x29e   : > { %1967 = vmatprep.subr.bf16.mxu0 %v1966_v38  ;;  %2047 = vmatprep.subr.bf16.mxu1 %v1966_v38 }
 0x2a1   : > { %1969 = vmatpush3.bf16.msra.mxu0 %v1966_v38  ;;  %2055 = vmatpush3.bf16.msra.mxu1 %v1966_v38 }
 0x2a2   : > { %1971 = vmatprep.subr.bf16.mxu0 %v1970_v41  ;;  %2048 = vmatprep.subr.bf16.mxu1 %v1970_v41 }
 0x2a5   : > { %1973 = vmatpush3.bf16.msra.mxu0 %v1970_v41  ;;  %2056 = vmatpush3.bf16.msra.mxu1 %v1970_v41 }
 0x2a6   : > { %1975 = vmatprep.subr.bf16.mxu0 %v1974_v44  ;;  %2049 = vmatprep.subr.bf16.mxu1 %v1974_v44 }
 0x2a9   : > { %1977 = vmatpush3.bf16.msra.mxu0 %v1974_v44  ;;  %2057 = vmatpush3.bf16.msra.mxu1 %v1974_v44 }
 0x2ac   : > { %1819 = vmatmul.mubr.bf16.vlgmr.msra.gmra.mrb[0].mxu0 %v2160_v45  ;;  %1827 = vmatmul.mubr.bf16.vlgmr.msra.gmra.mrb[0].mxu1 %v2161_v46 }
 0x2ad   : > { %1822 = vmatprep.mubr.bf16.mxu0 %v2162_v47  ;;  %1830 = vmatprep.mubr.bf16.mxu1 %v2163_v48 }
 0x2b4   : > { %1823 = vmatmul.mubr.bf16.gmra.mrb[4].mxu0 %v2164_v49  ;;  %1831 = vmatmul.mubr.bf16.gmra.mrb[4].mxu1 %v2165_v50 }
 0x37f   : > { %v1820_v55 = vpop.f32.mrb[0].mxu0  ;;  %v1828_v56 = vpop.f32.mrb[0].mxu1 }
 0x380   : > { %v993_v59 = vadd.f32 %v1820_v55, %v767_v51  ;;  %v1001_v60 = vadd.f32 %v1828_v56, %v775_v52  ;;  %v928_v61 = vpop.f32.mrb[1].mxu0  ;;  %v960_v62 = vpop.f32.mrb[1].mxu1 }
 0x381   : > { %v991_v1 = vadd.f32 %v928_v61, %v765_v53  ;;  %v999_v2 = vadd.f32 %v960_v62, %v773_v54  ;;  %v1821_v3 = vpop.f32.mrb[2].mxu0  ;;  %v1829_v4 = vpop.f32.mrb[2].mxu1 }
 0x382   : > { %1009 = vst [vmem:[#allocation5 + $0x10] sm:$0xff] %v993_v59  ;;  %v1044_v5 = vmax.f32 %v993_v59, 0.0  ;;  %1017 = vst [vmem:[#allocation5 + $0x50] sm:$0xff] %v1001_v60  ;;  %v1052_v6 = vmax.f32 %v1001_v60, 0.0  ;;  %v994_v7 = vadd.f32 %v1821_v3, %v768_v57  ;;  %v1002_v8 = vadd.f32 %v1829_v4, %v776_v58  ;;  %v931_v9 = vpop.f32.mrb[3].mxu0  ;;  %v963_v10 = vpop.f32.mrb[3].mxu1 }
 0x383   : > { %1007 = vst [vmem:[#allocation5] sm:$0xff] %v991_v1  ;;  %v1042_v11 = vmax.f32 %v991_v1, 0.0  ;;  %1015 = vst [vmem:[#allocation5 + $0x40] sm:$0xff] %v999_v2  ;;  %v1050_v12 = vmax.f32 %v999_v2, 0.0  ;;  %v992_v13 = vadd.f32 %v931_v9, %v766_v63  ;;  %v1000_v14 = vadd.f32 %v963_v10, %v774_v0 }
 0x384   : > { %1061 = vst [vmem:[#allocation3 + $0x10] sm:$0xff] %v1044_v5  ;;  %1069 = vst [vmem:[#allocation3 + $0x50] sm:$0xff] %v1052_v6  ;;  %v1045_v15 = vmax.f32 %v994_v7, 0.0  ;;  %v1053_v16 = vmax.f32 %v1002_v8, 0.0 }
 0x385   : > { %1010 = vst [vmem:[#allocation5 + $0x18] sm:$0xff] %v994_v7  ;;  %1018 = vst [vmem:[#allocation5 + $0x58] sm:$0xff] %v1002_v8  ;;  %v1043_v17 = vmax.f32 %v992_v13, 0.0  ;;  %v1051_v18 = vmax.f32 %v1000_v14, 0.0 }
 0x386   : > { %1059 = vst [vmem:[#allocation3] sm:$0xff] %v1042_v11  ;;  %1067 = vst [vmem:[#allocation3 + $0x40] sm:$0xff] %v1050_v12 }
 0x387   : > { %1008 = vst [vmem:[#allocation5 + $0x8] sm:$0xff] %v992_v13  ;;  %1016 = vst [vmem:[#allocation5 + $0x48] sm:$0xff] %v1000_v14  ;;  %v1824_v23 = vpop.f32.mrb[4].mxu0  ;;  %v1832_v24 = vpop.f32.mrb[4].mxu1 }
 0x388   : > { %1062 = vst [vmem:[#allocation3 + $0x18] sm:$0xff] %v1045_v15  ;;  %1070 = vst [vmem:[#allocation3 + $0x58] sm:$0xff] %v1053_v16  ;;  %v997_v27 = vadd.f32 %v1824_v23, %v771_v19  ;;  %v1005_v28 = vadd.f32 %v1832_v24, %v779_v20  ;;  %v944_v29 = vpop.f32.mrb[5].mxu0  ;;  %v976_v30 = vpop.f32.mrb[5].mxu1 }
 0x389   : > { %1060 = vst [vmem:[#allocation3 + $0x8] sm:$0xff] %v1043_v17  ;;  %1068 = vst [vmem:[#allocation3 + $0x48] sm:$0xff] %v1051_v18  ;;  %v995_v33 = vadd.f32 %v944_v29, %v769_v21  ;;  %v1003_v34 = vadd.f32 %v976_v30, %v777_v22  ;;  %v1825_v35 = vpop.f32.mrb[6].mxu0  ;;  %v1833_v36 = vpop.f32.mrb[6].mxu1 }
 0x38a   : > { %1013 = vst [vmem:[#allocation5 + $0x30] sm:$0xff] %v997_v27  ;;  %v1048_v37 = vmax.f32 %v997_v27, 0.0  ;;  %1021 = vst [vmem:[#allocation5 + $0x70] sm:$0xff] %v1005_v28  ;;  %v1056_v38 = vmax.f32 %v1005_v28, 0.0  ;;  %v998_v39 = vadd.f32 %v1825_v35, %v772_v25  ;;  %v1006_v40 = vadd.f32 %v1833_v36, %v780_v26  ;;  %v947_v41 = vpop.f32.mrb[7].mxu0  ;;  %v979_v42 = vpop.f32.mrb[7].mxu1 }
 0x38b   : > { %1011 = vst [vmem:[#allocation5 + $0x20] sm:$0xff] %v995_v33  ;;  %v1046_v43 = vmax.f32 %v995_v33, 0.0  ;;  %1019 = vst [vmem:[#allocation5 + $0x60] sm:$0xff] %v1003_v34  ;;  %v1054_v44 = vmax.f32 %v1003_v34, 0.0  ;;  %v996_v45 = vadd.f32 %v947_v41, %v770_v31  ;;  %v1004_v46 = vadd.f32 %v979_v42, %v778_v32 }
 0x38c   : > { %1065 = vst [vmem:[#allocation3 + $0x30] sm:$0xff] %v1048_v37  ;;  %1073 = vst [vmem:[#allocation3 + $0x70] sm:$0xff] %v1056_v38  ;;  %v1049_v47 = vmax.f32 %v998_v39, 0.0  ;;  %v1057_v48 = vmax.f32 %v1006_v40, 0.0 }
 0x38d   : > { %1014 = vst [vmem:[#allocation5 + $0x38] sm:$0xff] %v998_v39  ;;  %1022 = vst [vmem:[#allocation5 + $0x78] sm:$0xff] %v1006_v40  ;;  %v1047_v49 = vmax.f32 %v996_v45, 0.0  ;;  %v1055_v50 = vmax.f32 %v1004_v46, 0.0 }
 0x38e   : > { %1063 = vst [vmem:[#allocation3 + $0x20] sm:$0xff] %v1046_v43  ;;  %1071 = vst [vmem:[#allocation3 + $0x60] sm:$0xff] %v1054_v44 }
 0x38f   : > { %1012 = vst [vmem:[#allocation5 + $0x28] sm:$0xff] %v996_v45  ;;  %1020 = vst [vmem:[#allocation5 + $0x68] sm:$0xff] %v1004_v46 }
 0x390   : > { %1066 = vst [vmem:[#allocation3 + $0x38] sm:$0xff] %v1049_v47  ;;  %1074 = vst [vmem:[#allocation3 + $0x78] sm:$0xff] %v1057_v48 }
 0x391   : > { %1064 = vst [vmem:[#allocation3 + $0x28] sm:$0xff] %v1047_v49  ;;  %1072 = vst [vmem:[#allocation3 + $0x68] sm:$0xff] %v1055_v50 }
 0x392 PF: > { %p1547_p9 = scmp.ne.s32.totalorder %s2342_s21, 1 }
 0x393   : > { %v1111_v51 = vld [vmem:[#allocation4] sm:$0xff] (!%p1547_p9)  ;;  %v1112_v52 = vld [vmem:[#allocation4 + $0x8] sm:$0xff] (!%p1547_p9)  ;;  %v1113_v53 = vld [vmem:[#allocation4 + $0x10] sm:$0xff] (!%p1547_p9) }
 0x394   : > { %1077 = sbr.rel (%p1547_p9) target bundleno = 1180 (0x49c), region = 84  ;;  %v1978_v54 = vpack.c.bf16 (!%p1547_p9), %v1112_v52, %v1111_v51  ;;  %v1114_v55 = vld [vmem:[#allocation4 + $0x18] sm:$0xff] (!%p1547_p9)  ;;  %v1115_v57 = vld [vmem:[#allocation4 + $0x20] sm:$0xff] (!%p1547_p9)  ;;  %v1116_v58 = vld [vmem:[#allocation4 + $0x28] sm:$0xff] (!%p1547_p9) }
 0x395   : > { %v1982_v56 = vpack.c.bf16 (!%p1547_p9), %v1114_v55, %v1113_v53  ;;  %v1117_v59 = vld [vmem:[#allocation4 + $0x30] sm:$0xff] (!%p1547_p9)  ;;  %v1986_v60 = vpack.c.bf16 (!%p1547_p9), %v1116_v58, %v1115_v57  ;;  %v1118_v61 = vld [vmem:[#allocation4 + $0x38] sm:$0xff] (!%p1547_p9)  ;;  %v2166_v62 = vld [vmem:[#allocation6] sm:$0xff] (!%p1547_p9)  }
 0x396   : > { %1979 = vmatprep.subr.bf16.mxu0 (!%p1547_p9), %v1978_v54  ;;  %2058 = vmatprep.subr.bf16.mxu1 (!%p1547_p9), %v1978_v54  ;;  %v2167_v63 = vld [vmem:[#allocation6 + $0x20] sm:$0xff] (!%p1547_p9)   ;;  %v1990_v0 = vpack.c.bf16 (!%p1547_p9), %v1118_v61, %v1117_v59  ;;  %v1120_v2 = vld [vmem:[#allocation4 + $0x48] sm:$0xff] (!%p1547_p9)  ;;  %v1121_v4 = vld [vmem:[#allocation4 + $0x50] sm:$0xff] (!%p1547_p9) }
 0x397   : > { %1981 = vmatpush3.bf16.msra.mxu0 (!%p1547_p9), %v1978_v54  ;;  %2066 = vmatpush3.bf16.msra.mxu1 (!%p1547_p9), %v1978_v54  ;;  %v1119_v1 = vld [vmem:[#allocation4 + $0x40] sm:$0xff] (!%p1547_p9)  ;;  %v1122_v5 = vld [vmem:[#allocation4 + $0x58] sm:$0xff] (!%p1547_p9)  ;;  %v1124_v8 = vld [vmem:[#allocation4 + $0x68] sm:$0xff] (!%p1547_p9) }
 0x398   : > { %1983 = vmatprep.subr.bf16.mxu0 (!%p1547_p9), %v1982_v56  ;;  %2059 = vmatprep.subr.bf16.mxu1 (!%p1547_p9), %v1982_v56  ;;  %v1994_v3 = vpack.c.bf16 (!%p1547_p9), %v1120_v2, %v1119_v1  ;;  %v1998_v6 = vpack.c.bf16 (!%p1547_p9), %v1122_v5, %v1121_v4  ;;  %v1123_v7 = vld [vmem:[#allocation4 + $0x60] sm:$0xff] (!%p1547_p9)  ;;  %v1125_v10 = vld [vmem:[#allocation4 + $0x70] sm:$0xff] (!%p1547_p9)  ;;  %v1126_v11 = vld [vmem:[#allocation4 + $0x78] sm:$0xff] (!%p1547_p9) }
 0x399   : > { %1866 = vmatprep.mubr.bf16.mxu0 (!%p1547_p9), %v2166_v62  ;;  %1874 = vmatprep.mubr.bf16.mxu1 (!%p1547_p9), %v2167_v63  ;;  %v2002_v9 = vpack.c.bf16 (!%p1547_p9), %v1124_v8, %v1123_v7  ;;  %v2006_v12 = vpack.c.bf16 (!%p1547_p9), %v1126_v11, %v1125_v10  ;;  %v2168_v13 = vld [vmem:[#allocation6 + $0x8] sm:$0xff] (!%p1547_p9)   ;;  %v2170_v15 = vld [vmem:[#allocation6 + $0x10] sm:$0xff] (!%p1547_p9)   ;;  %v2172_v17 = vld [vmem:[#allocation6 + $0x18] sm:$0xff] (!%p1547_p9)  }
 0x39a   : > { %v2169_v14 = vld [vmem:[#allocation6 + $0x28] sm:$0xff] (!%p1547_p9)   ;;  %v2171_v16 = vld [vmem:[#allocation6 + $0x30] sm:$0xff] (!%p1547_p9)   ;;  %v2173_v18 = vld [vmem:[#allocation6 + $0x38] sm:$0xff] (!%p1547_p9)  }
 0x39b   : > { %1985 = vmatpush3.bf16.msra.mxu0 %v1982_v56  ;;  %2067 = vmatpush3.bf16.msra.mxu1 %v1982_v56  ;;  %v1080_v19 = vld [vmem:[#allocation5 + $0x10] sm:$0xff]  ;;  %v1078_v21 = vld [vmem:[#allocation5] sm:$0xff]  ;;  %v1081_v25 = vld [vmem:[#allocation5 + $0x18] sm:$0xff] }
 0x39c   : > { %1987 = vmatprep.subr.bf16.mxu0 %v1986_v60  ;;  %2060 = vmatprep.subr.bf16.mxu1 %v1986_v60  ;;  %v1088_v20 = vld [vmem:[#allocation5 + $0x50] sm:$0xff]  ;;  %v1086_v22 = vld [vmem:[#allocation5 + $0x40] sm:$0xff]  ;;  %v1089_v26 = vld [vmem:[#allocation5 + $0x58] sm:$0xff] }
 0x39d   : > { %v1079_v31 = vld [vmem:[#allocation5 + $0x8] sm:$0xff]  ;;  %v1084_v51 = vld [vmem:[#allocation5 + $0x30] sm:$0xff]  ;;  %v1082_v53 = vld [vmem:[#allocation5 + $0x20] sm:$0xff] }
 0x39e   : > { %v1087_v32 = vld [vmem:[#allocation5 + $0x48] sm:$0xff]  ;;  %v1092_v52 = vld [vmem:[#allocation5 + $0x70] sm:$0xff]  ;;  %v1090_v54 = vld [vmem:[#allocation5 + $0x60] sm:$0xff] }
 0x39f   : > { %1989 = vmatpush3.bf16.msra.mxu0 %v1986_v60  ;;  %2068 = vmatpush3.bf16.msra.mxu1 %v1986_v60  ;;  %v1085_v57 = vld [vmem:[#allocation5 + $0x38] sm:$0xff]  ;;  %v1083_v63 = vld [vmem:[#allocation5 + $0x28] sm:$0xff] }
 0x3a0   : > { %1991 = vmatprep.subr.bf16.mxu0 %v1990_v0  ;;  %2061 = vmatprep.subr.bf16.mxu1 %v1990_v0  ;;  %v1093_v58 = vld [vmem:[#allocation5 + $0x78] sm:$0xff] }
 0x3a3   : > { %1993 = vmatpush3.bf16.msra.mxu0 %v1990_v0  ;;  %2069 = vmatpush3.bf16.msra.mxu1 %v1990_v0  ;;  %v1091_v0 = vld [vmem:[#allocation5 + $0x68] sm:$0xff] }
 0x3a4   : > { %1995 = vmatprep.subr.bf16.mxu0 %v1994_v3  ;;  %2062 = vmatprep.subr.bf16.mxu1 %v1994_v3 }
 0x3a7   : > { %1997 = vmatpush3.bf16.msra.mxu0 %v1994_v3  ;;  %2070 = vmatpush3.bf16.msra.mxu1 %v1994_v3 }
 0x3a8   : > { %1999 = vmatprep.subr.bf16.mxu0 %v1998_v6  ;;  %2063 = vmatprep.subr.bf16.mxu1 %v1998_v6 }
 0x3ab   : > { %2001 = vmatpush3.bf16.msra.mxu0 %v1998_v6  ;;  %2071 = vmatpush3.bf16.msra.mxu1 %v1998_v6 }
 0x3ac   : > { %2003 = vmatprep.subr.bf16.mxu0 %v2002_v9  ;;  %2064 = vmatprep.subr.bf16.mxu1 %v2002_v9 }
 0x3af   : > { %2005 = vmatpush3.bf16.msra.mxu0 %v2002_v9  ;;  %2072 = vmatpush3.bf16.msra.mxu1 %v2002_v9 }
 0x3b0   : > { %2007 = vmatprep.subr.bf16.mxu0 %v2006_v12  ;;  %2065 = vmatprep.subr.bf16.mxu1 %v2006_v12 }
 0x3b3   : > { %2009 = vmatpush3.bf16.msra.mxu0 %v2006_v12  ;;  %2073 = vmatpush3.bf16.msra.mxu1 %v2006_v12 }
 0x3b6   : > { %1867 = vmatmul.mubr.bf16.vlgmr.msra.gmra.mrb[0].mxu0 %v2168_v13  ;;  %1875 = vmatmul.mubr.bf16.vlgmr.msra.gmra.mrb[0].mxu1 %v2169_v14 }
 0x3b7   : > { %1870 = vmatprep.mubr.bf16.mxu0 %v2170_v15  ;;  %1878 = vmatprep.mubr.bf16.mxu1 %v2171_v16 }
 0x3be   : > { %1871 = vmatmul.mubr.bf16.gmra.mrb[4].mxu0 %v2172_v17  ;;  %1879 = vmatmul.mubr.bf16.gmra.mrb[4].mxu1 %v2173_v18 }
 0x489   : > { %v1868_v23 = vpop.f32.mrb[0].mxu0  ;;  %v1876_v24 = vpop.f32.mrb[0].mxu1 }
 0x48a   : > { %v1306_v27 = vadd.f32 %v1868_v23, %v1080_v19  ;;  %v1314_v28 = vadd.f32 %v1876_v24, %v1088_v20  ;;  %v1241_v29 = vpop.f32.mrb[1].mxu0  ;;  %v1273_v30 = vpop.f32.mrb[1].mxu1 }
 0x48b   : > { %v1304_v33 = vadd.f32 %v1241_v29, %v1078_v21  ;;  %v1312_v34 = vadd.f32 %v1273_v30, %v1086_v22  ;;  %v1869_v35 = vpop.f32.mrb[2].mxu0  ;;  %v1877_v36 = vpop.f32.mrb[2].mxu1 }
 0x48c   : > { %1322 = vst [vmem:[#allocation5 + $0x10] sm:$0xff] %v1306_v27  ;;  %v1357_v37 = vmax.f32 %v1306_v27, 0.0  ;;  %1330 = vst [vmem:[#allocation5 + $0x50] sm:$0xff] %v1314_v28  ;;  %v1365_v38 = vmax.f32 %v1314_v28, 0.0  ;;  %v1307_v39 = vadd.f32 %v1869_v35, %v1081_v25  ;;  %v1315_v40 = vadd.f32 %v1877_v36, %v1089_v26  ;;  %v1244_v41 = vpop.f32.mrb[3].mxu0  ;;  %v1276_v42 = vpop.f32.mrb[3].mxu1 }
 0x48d   : > { %1320 = vst [vmem:[#allocation5] sm:$0xff] %v1304_v33  ;;  %v1355_v43 = vmax.f32 %v1304_v33, 0.0  ;;  %1328 = vst [vmem:[#allocation5 + $0x40] sm:$0xff] %v1312_v34  ;;  %v1363_v44 = vmax.f32 %v1312_v34, 0.0  ;;  %v1305_v45 = vadd.f32 %v1244_v41, %v1079_v31  ;;  %v1313_v46 = vadd.f32 %v1276_v42, %v1087_v32 }
 0x48e   : > { %1373 = vst [vmem:[#allocation14 + $0x10] sm:$0xff] %v1357_v37  ;;  %1381 = vst [vmem:[#allocation14 + $0x50] sm:$0xff] %v1365_v38  ;;  %v1358_v47 = vmax.f32 %v1307_v39, 0.0  ;;  %v1366_v48 = vmax.f32 %v1315_v40, 0.0 }
 0x48f   : > { %1323 = vst [vmem:[#allocation5 + $0x18] sm:$0xff] %v1307_v39  ;;  %1331 = vst [vmem:[#allocation5 + $0x58] sm:$0xff] %v1315_v40  ;;  %v1356_v49 = vmax.f32 %v1305_v45, 0.0  ;;  %v1364_v50 = vmax.f32 %v1313_v46, 0.0 }
 0x490   : > { %1371 = vst [vmem:[#allocation14] sm:$0xff] %v1355_v43  ;;  %1379 = vst [vmem:[#allocation14 + $0x40] sm:$0xff] %v1363_v44 }
 0x491   : > { %1321 = vst [vmem:[#allocation5 + $0x8] sm:$0xff] %v1305_v45  ;;  %1329 = vst [vmem:[#allocation5 + $0x48] sm:$0xff] %v1313_v46  ;;  %v1872_v55 = vpop.f32.mrb[4].mxu0  ;;  %v1880_v56 = vpop.f32.mrb[4].mxu1 }
 0x492   : > { %1374 = vst [vmem:[#allocation14 + $0x18] sm:$0xff] %v1358_v47  ;;  %1382 = vst [vmem:[#allocation14 + $0x58] sm:$0xff] %v1366_v48  ;;  %v1310_v59 = vadd.f32 %v1872_v55, %v1084_v51  ;;  %v1318_v60 = vadd.f32 %v1880_v56, %v1092_v52  ;;  %v1257_v61 = vpop.f32.mrb[5].mxu0  ;;  %v1289_v62 = vpop.f32.mrb[5].mxu1 }
 0x493   : > { %1372 = vst [vmem:[#allocation14 + $0x8] sm:$0xff] %v1356_v49  ;;  %1380 = vst [vmem:[#allocation14 + $0x48] sm:$0xff] %v1364_v50  ;;  %v1308_v1 = vadd.f32 %v1257_v61, %v1082_v53  ;;  %v1316_v2 = vadd.f32 %v1289_v62, %v1090_v54  ;;  %v1873_v3 = vpop.f32.mrb[6].mxu0  ;;  %v1881_v4 = vpop.f32.mrb[6].mxu1 }
 0x494   : > { %1326 = vst [vmem:[#allocation5 + $0x30] sm:$0xff] %v1310_v59  ;;  %v1361_v5 = vmax.f32 %v1310_v59, 0.0  ;;  %1334 = vst [vmem:[#allocation5 + $0x70] sm:$0xff] %v1318_v60  ;;  %v1369_v6 = vmax.f32 %v1318_v60, 0.0  ;;  %v1311_v7 = vadd.f32 %v1873_v3, %v1085_v57  ;;  %v1319_v8 = vadd.f32 %v1881_v4, %v1093_v58  ;;  %v1260_v9 = vpop.f32.mrb[7].mxu0  ;;  %v1292_v10 = vpop.f32.mrb[7].mxu1 }
 0x495   : > { %1324 = vst [vmem:[#allocation5 + $0x20] sm:$0xff] %v1308_v1  ;;  %v1359_v11 = vmax.f32 %v1308_v1, 0.0  ;;  %1332 = vst [vmem:[#allocation5 + $0x60] sm:$0xff] %v1316_v2  ;;  %v1367_v12 = vmax.f32 %v1316_v2, 0.0  ;;  %v1309_v13 = vadd.f32 %v1260_v9, %v1083_v63  ;;  %v1317_v14 = vadd.f32 %v1292_v10, %v1091_v0 }
 0x496   : > { %1377 = vst [vmem:[#allocation14 + $0x30] sm:$0xff] %v1361_v5  ;;  %1385 = vst [vmem:[#allocation14 + $0x70] sm:$0xff] %v1369_v6  ;;  %v1362_v15 = vmax.f32 %v1311_v7, 0.0  ;;  %v1370_v16 = vmax.f32 %v1319_v8, 0.0 }
 0x497   : > { %1327 = vst [vmem:[#allocation5 + $0x38] sm:$0xff] %v1311_v7  ;;  %1335 = vst [vmem:[#allocation5 + $0x78] sm:$0xff] %v1319_v8  ;;  %v1360_v17 = vmax.f32 %v1309_v13, 0.0  ;;  %v1368_v18 = vmax.f32 %v1317_v14, 0.0 }
 0x498   : > { %1375 = vst [vmem:[#allocation14 + $0x20] sm:$0xff] %v1359_v11  ;;  %1383 = vst [vmem:[#allocation14 + $0x60] sm:$0xff] %v1367_v12 }
 0x499   : > { %1325 = vst [vmem:[#allocation5 + $0x28] sm:$0xff] %v1309_v13  ;;  %1333 = vst [vmem:[#allocation5 + $0x68] sm:$0xff] %v1317_v14 }
 0x49a   : > { %1378 = vst [vmem:[#allocation14 + $0x38] sm:$0xff] %v1362_v15  ;;  %1386 = vst [vmem:[#allocation14 + $0x78] sm:$0xff] %v1370_v16 }
 0x49b   : > { %1376 = vst [vmem:[#allocation14 + $0x28] sm:$0xff] %v1360_v17  ;;  %1384 = vst [vmem:[#allocation14 + $0x68] sm:$0xff] %v1368_v18 }
 0x49c PF: > { %s2618_s21 = sadd.s32 4294967295, %s2350_s23   ;;  %s2361_s19 = smov [#allocation14]  }
 0x49d   : > { %p2565_p10 = scmp.eq.s32.totalorder %s2618_s21, 1  ;;  %s1402_s16 = sshll.u32 %s2361_s19, 4  ;;  %s1403_s16 = int_to_ptr.vmem [resolvable:$true] %s1402_s16 }
 0x49e   : > { %s2286_s8 = scalar_lea.vmem %s1403_s16, 2048  ;;  %s2292_s26 = scalar_lea.vmem %s1403_s16, 4096 }
 0x49f   : > { %p2287_p11 = scmp.ne.s32.totalorder %s1403_s16, %s2286_s8  ;;  %p2293_p0 = scmp.lt.s32.totalorder %s1403_s16, %s1403_s16 }
 0x4a0   : > { %p2294_p1 = scmp.lt.s32.totalorder %s2292_s26, %s2286_s8 }
 0x4a1   : > { %p2288_p12 = pnand %p2287_p11, %p2565_p10 }
 0x4a2   : > { %p2295_p4 = por %p2294_p1, %p2293_p0 }
 0x4a3   : > { %p2289_p13 = pneg %p2288_p12 }
 0x4a5   : > { %p2296_p7 = pnand %p2295_p4, %p2289_p13 }
 0x4a7   : > { %2299 = shalt.err (!%p2296_p7)
}
 0x4a8   : > { %s2300_s11 = scalar_lea.hbm %s2605_s6, 2048 }
 0x4a9   : > { %p2301_p2 = scmp.ne.s32.totalorder %s2605_s6, %s2300_s11  ;;  %p2306_p3 = scmp.lt.u32.totalorder %s2300_s11, %s2605_s6 }
 0x4ab   : > { %p2302_p8 = pnand %p2301_p2, %p2565_p10 }
 0x4ad   : > { %p2303_p5 = pneg %p2302_p8 }
 0x4af   : > { %p2308_p6 = pnand %p2306_p3, %p2303_p5 }
 0x4b1   : > { %2311 = shalt.err (!%p2308_p6)
}
 0x4b2   : > { %s2362_s25 = smov 128   ;;  %s2363_s13 = smov 8  }
 0x4b3   : > { %2091 = dma.vmem_to_hbm [thread:$0]  (%p2565_p10), %s1403_s16, 2048, %s2605_s6, [#allocation8], %s2362_s25, %s2362_s25, %s2363_s13  }
 0x4b4 PF: > { %p2120_p9 = scmp.ge.s32.totalorder %s2350_s23, 2  ;;  %s2620_s28 = sadd.s32 4294967294, %s2350_s23  }
 0x4b5   : > { %p2121_p11 = scmp.eq.s32.totalorder %s2620_s28, 1 }
 0x4b7   : > { %p2108_p12 = pnand %p2121_p11, %p2120_p9 }
 0x4b9   : > { %2337 = dma.done.wait (!%p2108_p12), [#allocation8], 2048  }
 0x4ba   : > { %2339 = vsyncadd (!%p2108_p12), [#allocation8], 4294965248  ;;  %s22_s23 = sadd.s32 1, %s2350_s23   ;;  %s2621_s21 = smov %s2346_s22 }
 0x4bb   : > { %p19_p13 = scmp.ge.s32.totalorder %s22_s23, 4   ;;  %s2622_s22 = smov %s2624_s7 }
 0x4bd   :  { %21 = sbr.rel (!%p19_p13) target bundleno = 6 (0x6), region = 129 }
 0x4c4   :  { %1423 = vsyncpa [#allocation7], 1 }
 0x4c5   :  { %1425 = vsyncpa [#allocation7 + $0x1], 1 }
 0x4c6   :  { %1426 = vsyncpa [#allocation10], 1 }
 0x4c7   :  { %1427 = vsyncpa [#allocation13], 1 }
 0x4c8   :  { %1428 = vsyncpa [#allocation8], 1 }
 0x4c9   :  { %1430 = vsyncpa [#allocation8 + $0x1], 1 }

</bundles_post_ra>
